<compile_context>
chip_gen: v6e
topology: v6e:2x2x1
jax: 0.10.0
libtpu: 0.0.40
codegen_flags: <defaults>
</compile_context>

<pallas_src>
import math

import jax
import jax.numpy as jnp
from jax.experimental import pallas as pl
from jax.experimental.pallas import tpu as pltpu

# logical (PyTorch) dims and their (8,128)-aligned padded counterparts
IN_F, H1_F, H2_F, OUT_F = 50, 100, 500, 1250
IN_P, H1_P, H2_P, OUT_P = 64, 128, 512, 1280


def _round_up(n, m):
    return ((n + m - 1) // m) * m


def _pad2(a, rows, cols):
    """Zero-pad a 2D array up to (rows, cols)."""
    return jnp.pad(a, ((0, rows - a.shape[0]), (0, cols - a.shape[1])))


def mlp3_kernel(x_ref, w1_ref, b1_ref, w2_ref, b2_ref, w3_ref, b3_ref, o_ref):
    # Layer 1: Linear(64 -> 128) + ReLU   (padded dims; zero padding keeps math exact)
    h1 = jnp.dot(x_ref[...], w1_ref[...], preferred_element_type=jnp.float32)
    h1 = jnp.maximum(h1 + b1_ref[...], 0.0)

    # Layer 2: Linear(128 -> 512) + ReLU
    h2 = jnp.dot(h1, w2_ref[...], preferred_element_type=jnp.float32)
    h2 = jnp.maximum(h2 + b2_ref[...], 0.0)

    # Layer 3: Linear(512 -> 1280) + Sigmoid (exp lands on the EUP slot)
    h3 = jnp.dot(h2, w3_ref[...], preferred_element_type=jnp.float32)
    h3 = h3 + b3_ref[...]
    o_ref[...] = (1.0 / (1.0 + jnp.exp(-h3))).astype(o_ref.dtype)


def simple3nn_forward(x, params, *, max_batch_tile=256):
    """x: [B, 50] float32 -> [B, 1250] float32."""
    w1, b1, w2, b2, w3, b3 = params
    B = x.shape[0]

    # Zero-pad feature dims to lane/sublane-aligned sizes (exact).
    xp = _pad2(x.astype(jnp.float32), B, IN_P)
    w1p, b1p = _pad2(w1, IN_P, H1_P), _pad2(b1, 1, H1_P)
    w2p, b2p = _pad2(w2, H1_P, H2_P), _pad2(b2, 1, H2_P)
    w3p, b3p = _pad2(w3, H2_P, OUT_P), _pad2(b3, 1, OUT_P)

    # Batch tiling: TB rows per grid step (multiple of 8; capped so the
    # double-buffered (TB, 1280) f32 output tiles plus resident weights stay
    # well inside the scoped VMEM limit on every TPU generation, incl. v7x).
    TB = min(max_batch_tile, _round_up(B, 8))
    B_pad = _round_up(B, TB)
    if B_pad != B:
        xp = jnp.pad(xp, ((0, B_pad - B), (0, 0)))

    grid = (B_pad // TB,)

    # Weights/biases: same block every grid step -> stay VMEM-resident.
    resident = lambda shape: pl.BlockSpec(shape, lambda i: (0, 0))

    out_padded = pl.pallas_call(
        mlp3_kernel,
        out_shape=jax.ShapeDtypeStruct((B_pad, OUT_P), jnp.float32),
        grid=grid,
        in_specs=[
            pl.BlockSpec((TB, IN_P), lambda i: (i, 0)),   # x tile, streamed
            resident(w1p.shape), resident(b1p.shape),
            resident(w2p.shape), resident(b2p.shape),
            resident(w3p.shape), resident(b3p.shape),
        ],
        out_specs=pl.BlockSpec((TB, OUT_P), lambda i: (i, 0)),
        compiler_params=pltpu.CompilerParams(
            dimension_semantics=("parallel",),  # shard batch tiles across TCs (v7x)
        ),
    )(xp, w1p, b1p, w2p, b2p, w3p, b3p)

    return out_padded[:B, :OUT_F]


def init_params(key):
    """Deterministic init mimicking PyTorch nn.Linear default (uniform +-1/sqrt(fan_in))."""
    dims = [(IN_F, H1_F), (H1_F, H2_F), (H2_F, OUT_F)]
    params = []
    for (fan_in, fan_out) in dims:
        key, kw, kb = jax.random.split(key, 3)
        bound = 1.0 / math.sqrt(fan_in)
        w = jax.random.uniform(kw, (fan_in, fan_out), jnp.float32, -bound, bound)
        b = jax.random.uniform(kb, (1, fan_out), jnp.float32, -bound, bound)
        params.extend([w, b])
    return tuple(params)


def reference_forward(x, params):
    w1, b1, w2, b2, w3, b3 = params
    h = jnp.maximum(x @ w1 + b1, 0.0)
    h = jnp.maximum(h @ w2 + b2, 0.0)
    return jax.nn.sigmoid(h @ w3 + b3)


if __name__ == "__main__":
    key = jax.random.PRNGKey(0)
    key, kx1, kx2 = jax.random.split(key, 3)
    params = init_params(key)

    # Small batch (single grid step).
    B1 = 8
    x1 = jax.random.normal(kx1, (B1, IN_F), jnp.float32)
    out1 = jax.block_until_ready(simple3nn_forward(x1, params))
    ref1 = reference_forward(x1, params)
    assert out1.shape == (B1, OUT_F), out1.shape
    assert jnp.allclose(out1, ref1, atol=1e-5, rtol=1e-5), "mismatch vs reference (B=8)"

    # Ragged batch with multiple grid steps (exercises tiling + batch padding).
    B2 = 72
    x2 = jax.random.normal(kx2, (B2, IN_F), jnp.float32)
    out2 = jax.block_until_ready(simple3nn_forward(x2, params, max_batch_tile=32))
    ref2 = reference_forward(x2, params)
    assert out2.shape == (B2, OUT_F), out2.shape
    assert jnp.allclose(out2, ref2, atol=1e-5, rtol=1e-5), "mismatch vs reference (B=72)"

    print("KERNEL_OK")
</pallas_src>

<mosaic_0001>
module attributes {stable_mosaic.version = 11 : i64} {
  func.func @mlp3_kernel(%arg0: i32, %arg1: memref<8x64xf32, #tpu.memory_space<vmem>>, %arg2: memref<64x128xf32, #tpu.memory_space<vmem>>, %arg3: memref<1x128xf32, #tpu.memory_space<vmem>>, %arg4: memref<128x512xf32, #tpu.memory_space<vmem>>, %arg5: memref<1x512xf32, #tpu.memory_space<vmem>>, %arg6: memref<512x1280xf32, #tpu.memory_space<vmem>>, %arg7: memref<1x1280xf32, #tpu.memory_space<vmem>>, %arg8: memref<8x1280xf32, #tpu.memory_space<vmem>>) attributes {dimension_semantics = [#tpu.dimension_semantics<parallel>], iteration_bounds = array<i64: 1>, scalar_prefetch = 0 : i64, scratch_operands = 0 : i64, tpu.core_type = #tpu.core_type<tc>, window_params = [{transform_indices = @transform_0, window_bounds = array<i64: 8, 64>}, {pipeline_mode = #tpu.pipeline_mode<synchronous>, transform_indices = @transform_1, window_bounds = array<i64: 64, 128>}, {pipeline_mode = #tpu.pipeline_mode<synchronous>, transform_indices = @transform_2, window_bounds = array<i64: 1, 128>}, {pipeline_mode = #tpu.pipeline_mode<synchronous>, transform_indices = @transform_3, window_bounds = array<i64: 128, 512>}, {pipeline_mode = #tpu.pipeline_mode<synchronous>, transform_indices = @transform_4, window_bounds = array<i64: 1, 512>}, {pipeline_mode = #tpu.pipeline_mode<synchronous>, transform_indices = @transform_5, window_bounds = array<i64: 512, 1280>}, {pipeline_mode = #tpu.pipeline_mode<synchronous>, transform_indices = @transform_6, window_bounds = array<i64: 1, 1280>}, {transform_indices = @transform_7, window_bounds = array<i64: 8, 1280>}]} {
    %c0 = arith.constant 0 : index
    %c0_0 = arith.constant 0 : index
    %0 = vector.load %arg1[%c0, %c0_0] : memref<8x64xf32, #tpu.memory_space<vmem>>, vector<8x64xf32>
    %c0_1 = arith.constant 0 : index
    %c0_2 = arith.constant 0 : index
    %1 = vector.load %arg2[%c0_1, %c0_2] : memref<64x128xf32, #tpu.memory_space<vmem>>, vector<64x128xf32>
    %cst = arith.constant dense<0.000000e+00> : vector<8x128xf32>
    %2 = tpu.matmul %0, %1, %cst {dimension_numbers = #tpu.dot_dimension_numbers<[1], [0], [0], [1], [0, 0, 1, 1], [], []>} : vector<8x64xf32>, vector<64x128xf32>, vector<8x128xf32> -> vector<8x128xf32>
    %c0_3 = arith.constant 0 : index
    %c0_4 = arith.constant 0 : index
    %3 = vector.load %arg3[%c0_3, %c0_4] : memref<1x128xf32, #tpu.memory_space<vmem>>, vector<1x128xf32>
    %4 = vector.broadcast %3 : vector<1x128xf32> to vector<8x128xf32>
    %5 = arith.addf %2, %4 : vector<8x128xf32>
    %cst_5 = arith.constant 0.000000e+00 : f32
    %6 = vector.broadcast %cst_5 : f32 to vector<8x128xf32>
    %7 = arith.maximumf %5, %6 : vector<8x128xf32>
    %c0_6 = arith.constant 0 : index
    %c0_7 = arith.constant 0 : index
    %8 = vector.load %arg4[%c0_6, %c0_7] : memref<128x512xf32, #tpu.memory_space<vmem>>, vector<128x512xf32>
    %cst_8 = arith.constant dense<0.000000e+00> : vector<8x512xf32>
    %9 = tpu.matmul %7, %8, %cst_8 {dimension_numbers = #tpu.dot_dimension_numbers<[1], [0], [0], [1], [0, 0, 1, 1], [], []>} : vector<8x128xf32>, vector<128x512xf32>, vector<8x512xf32> -> vector<8x512xf32>
    %c0_9 = arith.constant 0 : index
    %c0_10 = arith.constant 0 : index
    %10 = vector.load %arg5[%c0_9, %c0_10] : memref<1x512xf32, #tpu.memory_space<vmem>>, vector<1x512xf32>
    %11 = vector.broadcast %10 : vector<1x512xf32> to vector<8x512xf32>
    %12 = arith.addf %9, %11 : vector<8x512xf32>
    %cst_11 = arith.constant 0.000000e+00 : f32
    %13 = vector.broadcast %cst_11 : f32 to vector<8x512xf32>
    %14 = arith.maximumf %12, %13 : vector<8x512xf32>
    %c0_12 = arith.constant 0 : index
    %c0_13 = arith.constant 0 : index
    %15 = vector.load %arg6[%c0_12, %c0_13] : memref<512x1280xf32, #tpu.memory_space<vmem>>, vector<512x1280xf32>
    %cst_14 = arith.constant dense<0.000000e+00> : vector<8x1280xf32>
    %16 = tpu.matmul %14, %15, %cst_14 {dimension_numbers = #tpu.dot_dimension_numbers<[1], [0], [0], [1], [0, 0, 1, 1], [], []>} : vector<8x512xf32>, vector<512x1280xf32>, vector<8x1280xf32> -> vector<8x1280xf32>
    %c0_15 = arith.constant 0 : index
    %c0_16 = arith.constant 0 : index
    %17 = vector.load %arg7[%c0_15, %c0_16] : memref<1x1280xf32, #tpu.memory_space<vmem>>, vector<1x1280xf32>
    %18 = vector.broadcast %17 : vector<1x1280xf32> to vector<8x1280xf32>
    %19 = arith.addf %16, %18 : vector<8x1280xf32>
    %cst_17 = arith.constant 0.000000e+00 : f32
    %20 = vector.broadcast %cst_17 : f32 to vector<8x1280xf32>
    %21 = arith.subf %20, %19 : vector<8x1280xf32>
    %22 = math.exp %21 : vector<8x1280xf32>
    %cst_18 = arith.constant 1.000000e+00 : f32
    %23 = vector.broadcast %cst_18 : f32 to vector<8x1280xf32>
    %24 = arith.addf %23, %22 : vector<8x1280xf32>
    %cst_19 = arith.constant 1.000000e+00 : f32
    %25 = vector.broadcast %cst_19 : f32 to vector<8x1280xf32>
    %26 = arith.divf %25, %24 : vector<8x1280xf32>
    %c0_20 = arith.constant 0 : index
    %c0_21 = arith.constant 0 : index
    %27 = vector.load %arg8[%c0_20, %c0_21] : memref<8x1280xf32, #tpu.memory_space<vmem>>, vector<8x1280xf32>
    tpu.vector_store %arg8[%c0_20, %c0_21], %26 {strides = array<i32>} : memref<8x1280xf32, #tpu.memory_space<vmem>>, vector<8x1280xf32>,
    return
  }
  func.func @transform_0(%arg0: i32) -> (i32, i32) {
    %c0_i32 = arith.constant 0 : i32
    %c0_i32_0 = arith.constant 0 : i32
    return %arg0, %c0_i32 : i32, i32
  }
  func.func @transform_1(%arg0: i32) -> (i32, i32) {
    %c0_i32 = arith.constant 0 : i32
    %c0_i32_0 = arith.constant 0 : i32
    %c0_i32_1 = arith.constant 0 : i32
    return %c0_i32, %c0_i32_0 : i32, i32
  }
  func.func @transform_2(%arg0: i32) -> (i32, i32) {
    %c0_i32 = arith.constant 0 : i32
    %c0_i32_0 = arith.constant 0 : i32
    %c0_i32_1 = arith.constant 0 : i32
    return %c0_i32, %c0_i32_0 : i32, i32
  }
  func.func @transform_3(%arg0: i32) -> (i32, i32) {
    %c0_i32 = arith.constant 0 : i32
    %c0_i32_0 = arith.constant 0 : i32
    %c0_i32_1 = arith.constant 0 : i32
    return %c0_i32, %c0_i32_0 : i32, i32
  }
  func.func @transform_4(%arg0: i32) -> (i32, i32) {
    %c0_i32 = arith.constant 0 : i32
    %c0_i32_0 = arith.constant 0 : i32
    %c0_i32_1 = arith.constant 0 : i32
    return %c0_i32, %c0_i32_0 : i32, i32
  }
  func.func @transform_5(%arg0: i32) -> (i32, i32) {
    %c0_i32 = arith.constant 0 : i32
    %c0_i32_0 = arith.constant 0 : i32
    %c0_i32_1 = arith.constant 0 : i32
    return %c0_i32, %c0_i32_0 : i32, i32
  }
  func.func @transform_6(%arg0: i32) -> (i32, i32) {
    %c0_i32 = arith.constant 0 : i32
    %c0_i32_0 = arith.constant 0 : i32
    %c0_i32_1 = arith.constant 0 : i32
    return %c0_i32, %c0_i32_0 : i32, i32
  }
  func.func @transform_7(%arg0: i32) -> (i32, i32) {
    %c0_i32 = arith.constant 0 : i32
    %c0_i32_0 = arith.constant 0 : i32
    return %arg0, %c0_i32 : i32, i32
  }
}

</mosaic_0001>

<bundles_post_ra>
// kernel: tpu_custom_call.1
= control target key start
LH: loop header
LB: loop body
LE: loop exit
PB: predicated region body
PF: predicated region fallthrough
CT: control target
= control target key end

     0   :  { %12 = vsyncpa [#allocation3], 0  ;;  %s2342_s0 = inlined_call_operand.hbm [shape: f32[8,64], index: 0, kind: input, shape index: {}]   ;;  %s2343_s1 = inlined_call_operand.hbm [shape: f32[64,128], index: 1, kind: input, shape index: {}]   ;;  %s2344_s2 = inlined_call_operand.hbm [shape: f32[1,128], index: 2, kind: input, shape index: {}]   ;;  %s2345_s3 = inlined_call_operand.hbm [shape: f32[128,512], index: 3, kind: input, shape index: {}]   ;;  %s2346_s4 = inlined_call_operand.hbm [shape: f32[1,512], index: 4, kind: input, shape index: {}]   ;;  %s2347_s5 = inlined_call_operand.hbm [shape: f32[512,1280], index: 5, kind: input, shape index: {}]   ;;  %s2348_s6 = inlined_call_operand.hbm [shape: f32[1,1280], index: 6, kind: input, shape index: {}]   ;;  %s2349_s7 = inlined_call_operand.hbm [shape: f32[8,1280], index: 7, kind: output, shape index: {}]  }
   0x1   :  { %13 = vsyncpa [#allocation6], 0 }
   0x2   :  { %14 = vsyncpa [#allocation9], 0 }
   0x3   :  { %15 = vsyncpa [#allocation12], 0 }
   0x4   :  { %16 = vsyncpa [#allocation4], 0  ;;  %s2185_s24 = smov [#allocation5]  }
   0x5   :  { %s32_s25 = sshll.u32 %s2185_s24, 4  ;;  %s33_s25 = int_to_ptr.vmem [resolvable:$true] %s32_s25 }
   0x6   :  { %s2023_s26 = scalar_lea.vmem %s33_s25, 1024  ;;  %p2028_p1 = scmp.lt.s32.totalorder %s33_s25, %s33_s25 }
   0x7   :  { %p2024_p0 = scmp.ne.s32.totalorder %s33_s25, %s2023_s26  ;;  %p2029_p2 = scmp.lt.s32.totalorder %s2023_s26, %s2023_s26 }
   0x9   :  { %p2030_p3 = por %p2029_p2, %p2028_p1 }
   0xb   :  { %p2031_p4 = pnand %p2030_p3, %p2024_p0 }
   0xd   :  { %2034 = shalt.err (!%p2031_p4)
}
   0xe   :  { %s2186_s27 = smov 128   ;;  %s2187_s28 = smov 8  }
   0xf   :  { %38 = dma.hbm_to_vmem [thread:$0]  %s2343_s1, 1024, %s33_s25, [#allocation6], %s2186_s27, %s2186_s27, %s2187_s28  }
  0x10   :  { %s2188_s8 = smov [#allocation8]  }
  0x11   :  { %s54_s9 = sshll.u32 %s2188_s8, 4  ;;  %s55_s9 = int_to_ptr.vmem [resolvable:$true] %s54_s9 }
  0x12   :  { %s2043_s10 = scalar_lea.vmem %s55_s9, 8192  ;;  %p2048_p6 = scmp.lt.s32.totalorder %s55_s9, %s55_s9 }
  0x13   :  { %p2044_p5 = scmp.ne.s32.totalorder %s55_s9, %s2043_s10  ;;  %p2049_p7 = scmp.lt.s32.totalorder %s2043_s10, %s2043_s10 }
  0x15   :  { %p2050_p8 = por %p2049_p7, %p2048_p6 }
  0x17   :  { %p2051_p9 = pnand %p2050_p8, %p2044_p5 }
  0x19   :  { %2054 = shalt.err (!%p2051_p9)
}
  0x1a   :  { %s2189_s11 = smov 512   ;;  %s2190_s12 = smov 32  }
  0x1b   :  { %60 = dma.hbm_to_vmem [thread:$0]  %s2345_s3, 8192, %s55_s9, [#allocation9], %s2189_s11, %s2189_s11, %s2190_s12  }
  0x1c   :  { %s2191_s15 = smov [#allocation11]  }
  0x1d   :  { %s76_s16 = sshll.u32 %s2191_s15, 4  ;;  %s77_s16 = int_to_ptr.vmem [resolvable:$true] %s76_s16 }
  0x1e   :  { %s2063_s1 = scalar_lea.vmem %s77_s16, 81920  ;;  %p2068_p11 = scmp.lt.s32.totalorder %s77_s16, %s77_s16 }
  0x1f   :  { %p2064_p10 = scmp.ne.s32.totalorder %s77_s16, %s2063_s1  ;;  %p2069_p12 = scmp.lt.s32.totalorder %s2063_s1, %s2063_s1 }
  0x21   :  { %p2070_p13 = por %p2069_p12, %p2068_p11 }
  0x23   :  { %p2071_p0 = pnand %p2070_p13, %p2064_p10 }
  0x25   :  { %2074 = shalt.err (!%p2071_p0)
}
  0x26   :  { %s2192_s17 = smov 1280   ;;  %s2193_s18 = smov 80  }
  0x27   :  { %82 = dma.hbm_to_vmem [thread:$0]  %s2347_s5, 81920, %s77_s16, [#allocation12], %s2192_s17, %s2192_s17, %s2193_s18  }
  0x28   :  { %s2194_s21 = smov [#allocation2]   ;;  %s2195_s3 = smov [#allocation7]  }
  0x29   :  { %s23_s22 = sshll.u32 %s2194_s21, 4  ;;  %s45_s23 = sshll.u32 %s2195_s3, 4  ;;  %s24_s22 = int_to_ptr.vmem [resolvable:$true] %s23_s22  ;;  %s46_s23 = int_to_ptr.vmem [resolvable:$true] %s45_s23 }
  0x2a   :  { %s2083_s24 = scalar_lea.vmem %s24_s22, 128  ;;  %p2088_p2 = scmp.lt.s32.totalorder %s24_s22, %s24_s22 }
  0x2b   :  { %p2084_p1 = scmp.ne.s32.totalorder %s24_s22, %s2083_s24  ;;  %p2089_p3 = scmp.lt.s32.totalorder %s2083_s24, %s2083_s24 }
  0x2d   :  { %p2090_p4 = por %p2089_p3, %p2088_p2 }
  0x2f   :  { %p2091_p5 = pnand %p2090_p4, %p2084_p1 }
  0x31   :  { %2094 = shalt.err (!%p2091_p5)
}
  0x32   :  { %26 = dma.hbm_to_vmem [thread:$0]  %s2342_s0, 128, %s24_s22, [#allocation3]  }
  0x33   :  { %s2103_s27 = scalar_lea.vmem %s46_s23, 16  ;;  %s2107_s5 = scalar_lea.vmem %s46_s23, 32 }
  0x34   :  { %p2104_p6 = scmp.ne.s32.totalorder %s46_s23, %s2103_s27  ;;  %p2108_p7 = scmp.lt.s32.totalorder %s46_s23, %s46_s23 }
  0x35   :  { %p2109_p8 = scmp.lt.s32.totalorder %s2107_s5, %s2103_s27 }
  0x37   :  { %p2110_p9 = por %p2109_p8, %p2108_p7 }
  0x39   :  { %p2111_p10 = pnand %p2110_p9, %p2104_p6 }
  0x3b   :  { %2114 = shalt.err (!%p2111_p10)
}
  0x3c   :  { %48 = dma.hbm_to_vmem [thread:$0]  %s2344_s2, 16, %s46_s23, [#allocation6]  }
  0x3d   :  { %s2196_s30 = smov [#allocation10]   ;;  %s2197_s9 = smov [#allocation13]  }
  0x3e   :  { %s67_s8 = sshll.u32 %s2196_s30, 4  ;;  %s89_s10 = sshll.u32 %s2197_s9, 4  ;;  %s68_s8 = int_to_ptr.vmem [resolvable:$true] %s67_s8  ;;  %s90_s10 = int_to_ptr.vmem [resolvable:$true] %s89_s10 }
  0x3f   :  { %s2123_s11 = scalar_lea.vmem %s68_s8, 64  ;;  %p2128_p12 = scmp.lt.s32.totalorder %s68_s8, %s68_s8 }
  0x40   :  { %p2124_p11 = scmp.ne.s32.totalorder %s68_s8, %s2123_s11  ;;  %p2129_p13 = scmp.lt.s32.totalorder %s2123_s11, %s2123_s11 }
  0x42   :  { %p2130_p0 = por %p2129_p13, %p2128_p12 }
  0x44   :  { %p2131_p1 = pnand %p2130_p0, %p2124_p11 }
  0x46   :  { %2134 = shalt.err (!%p2131_p1)
}
  0x47   :  { %70 = dma.hbm_to_vmem [thread:$0]  %s2346_s4, 64, %s68_s8, [#allocation9]  }
  0x48   :  { %s2143_s13 = scalar_lea.vmem %s90_s10, 160  ;;  %p2148_p3 = scmp.lt.s32.totalorder %s90_s10, %s90_s10 }
  0x49   :  { %p2144_p2 = scmp.ne.s32.totalorder %s90_s10, %s2143_s13  ;;  %p2149_p4 = scmp.lt.s32.totalorder %s2143_s13, %s2143_s13 }
  0x4b   :  { %p2150_p5 = por %p2149_p4, %p2148_p3 }
  0x4d   :  { %p2151_p6 = pnand %p2150_p5, %p2144_p2 }
  0x4f   :  { %2154 = shalt.err (!%p2151_p6)
}
  0x50   :  { %92 = dma.hbm_to_vmem [thread:$0]  %s2348_s6, 160, %s90_s10, [#allocation12]  }
  0x51   :  { %2175 = dma.done.wait [#allocation3], 128  }
  0x52   :  { %2176 = vsyncadd [#allocation3], 4294967168 }
  0x53   :  { %2177 = dma.done.wait [#allocation6], 1040  }
  0x54   :  { %2178 = vsyncadd [#allocation6], 4294966256 }
  0x55   :  { %2179 = dma.done.wait [#allocation9], 8256  }
  0x56   :  { %2180 = vsyncadd [#allocation9], 4294959040 }
  0x57   :  { %2181 = dma.done.wait [#allocation12], 82080  }
  0x58   :  { %2182 = vsyncadd [#allocation12], 4294885216  ;;  %v2198_v0 = vmov 0.0   ;;  %vm2199_vm0 = vmmov 0   ;;  %v122_v1 = vld [vmem:[#allocation5 + $0x38] sm:$0xff]  ;;  %v121_v2 = vld [vmem:[#allocation5 + $0x30] sm:$0xff] }
  0x59   :  { %1940 = vmatprep.subr.mxu0 %v2198_v0  ;;  %1956 = vmatprep.mubr.msk.f32.mxu0 %vm2199_vm0, %v2198_v0  ;;  %v120_v3 = vld [vmem:[#allocation5 + $0x28] sm:$0xff]  ;;  %v119_v6 = vld [vmem:[#allocation5 + $0x20] sm:$0xff]  ;;  %v118_v10 = vld [vmem:[#allocation5 + $0x18] sm:$0xff]  ;;  %vm130_vm1 = vcmask 523264   ;;  %s2200_s4 = smov [#allocation14]  }
  0x5a   :  { %355 = vmatprep.mubr.f32.mxu1 %v2198_v0  ;;  %1941 = vmatpush3.msra.mxu0 %v122_v1  ;;  %v266_v4 = vld [vmem:[#allocation8 + $0x1e8] sm:$0xff]  ;;  %v265_v5 = vld [vmem:[#allocation8 + $0x1e0] sm:$0xff]  ;;  %v114_v21 = vld [vmem:[#allocation2] sm:$0xff]  ;;  %s1917_s6 = sshll.u32 %s2200_s4, 4  ;;  %s1918_s6 = int_to_ptr.vmem [resolvable:$true] %s1917_s6 }
  0x5b   :  { %1942 = vmatprep.subr.mxu0 %v2198_v0  ;;  %291 = vmatprep.subr.mxu1 %v266_v4  ;;  %v262_v7 = vld [vmem:[#allocation8 + $0x1c8] sm:$0xff]  ;;  %v261_v8 = vld [vmem:[#allocation8 + $0x1c0] sm:$0xff]  ;;  %v268_v22 = vld [vmem:[#allocation8 + $0x1f8] sm:$0xff]  ;;  %s2155_s15 = scalar_lea.vmem %s1918_s6, 1280  ;;  %p2160_p8 = scmp.lt.s32.totalorder %s1918_s6, %s1918_s6 }
  0x5c   :  { %1943 = vmatpush3.msra.mxu0 %v121_v2  ;;  %292 = vmatpush1.msra.mxu1 %v265_v5  ;;  %v258_v9 = vld [vmem:[#allocation8 + $0x1a8] sm:$0xff]  ;;  %v257_v11 = vld [vmem:[#allocation8 + $0x1a0] sm:$0xff]  ;;  %v267_v23 = vld [vmem:[#allocation8 + $0x1f0] sm:$0xff]  ;;  %p2156_p7 = scmp.ne.s32.totalorder %s1918_s6, %s2155_s15  ;;  %p2161_p9 = scmp.lt.s32.totalorder %s2155_s15, %s2155_s15 }
  0x5d   :  { %1944 = vmatprep.subr.mxu0 %v2198_v0  ;;  %293 = vmatprep.subr.mxu1 %v262_v7  ;;  %v254_v12 = vld [vmem:[#allocation8 + $0x188] sm:$0xff]  ;;  %v253_v14 = vld [vmem:[#allocation8 + $0x180] sm:$0xff]  ;;  %v264_v25 = vld [vmem:[#allocation8 + $0x1d8] sm:$0xff] }
  0x5e   :  { %1945 = vmatpush3.msra.mxu0 %v120_v3  ;;  %294 = vmatpush1.msra.mxu1 %v261_v8  ;;  %v117_v13 = vld [vmem:[#allocation5 + $0x10] sm:$0xff]  ;;  %v116_v16 = vld [vmem:[#allocation5 + $0x8] sm:$0xff]  ;;  %v115_v19 = vld [vmem:[#allocation5] sm:$0xff]  ;;  %p2162_p10 = por %p2161_p9, %p2160_p8 }
  0x5f   :  { %1946 = vmatprep.subr.mxu0 %v2198_v0  ;;  %295 = vmatprep.subr.mxu1 %v258_v9  ;;  %v250_v15 = vld [vmem:[#allocation8 + $0x168] sm:$0xff]  ;;  %v249_v17 = vld [vmem:[#allocation8 + $0x160] sm:$0xff]  ;;  %v263_v27 = vld [vmem:[#allocation8 + $0x1d0] sm:$0xff] }
  0x60   :  { %1947 = vmatpush3.msra.mxu0 %v119_v6  ;;  %296 = vmatpush1.msra.mxu1 %v257_v11  ;;  %v246_v18 = vld [vmem:[#allocation8 + $0x148] sm:$0xff]  ;;  %v245_v20 = vld [vmem:[#allocation8 + $0x140] sm:$0xff]  ;;  %v260_v29 = vld [vmem:[#allocation8 + $0x1b8] sm:$0xff]  ;;  %p2163_p11 = pnand %p2162_p10, %p2156_p7 }
  0x61   :  { %1948 = vmatprep.subr.mxu0 %v2198_v0  ;;  %297 = vmatprep.subr.mxu1 %v254_v12  ;;  %v242_v24 = vld [vmem:[#allocation8 + $0x128] sm:$0xff]  ;;  %v241_v26 = vld [vmem:[#allocation8 + $0x120] sm:$0xff]  ;;  %v259_v31 = vld [vmem:[#allocation8 + $0x1b0] sm:$0xff] }
  0x62   :  { %1949 = vmatpush3.msra.mxu0 %v118_v10  ;;  %298 = vmatpush1.msra.mxu1 %v253_v14  ;;  %v238_v28 = vld [vmem:[#allocation8 + $0x108] sm:$0xff]  ;;  %v237_v30 = vld [vmem:[#allocation8 + $0x100] sm:$0xff]  ;;  %v256_v33 = vld [vmem:[#allocation8 + $0x198] sm:$0xff] }
  0x63   :  { %1950 = vmatprep.subr.mxu0 %v2198_v0  ;;  %299 = vmatprep.subr.mxu1 %v250_v15  ;;  %v234_v32 = vld [vmem:[#allocation8 + $0xe8] sm:$0xff]  ;;  %v233_v34 = vld [vmem:[#allocation8 + $0xe0] sm:$0xff]  ;;  %v255_v35 = vld [vmem:[#allocation8 + $0x190] sm:$0xff] }
  0x64   :  { %1951 = vmatpush3.msra.mxu0 %v117_v13  ;;  %300 = vmatpush1.msra.mxu1 %v249_v17  ;;  %v230_v36 = vld [vmem:[#allocation8 + $0xc8] sm:$0xff]  ;;  %v252_v37 = vld [vmem:[#allocation8 + $0x178] sm:$0xff]  ;;  %v229_v38 = vld [vmem:[#allocation8 + $0xc0] sm:$0xff] }
  0x65   :  { %1952 = vmatprep.subr.mxu0 %v2198_v0  ;;  %301 = vmatprep.subr.mxu1 %v246_v18  ;;  %v251_v39 = vld [vmem:[#allocation8 + $0x170] sm:$0xff]  ;;  %v226_v40 = vld [vmem:[#allocation8 + $0xa8] sm:$0xff]  ;;  %v248_v41 = vld [vmem:[#allocation8 + $0x158] sm:$0xff] }
  0x66   :  { %1953 = vmatpush3.msra.mxu0 %v116_v16  ;;  %302 = vmatpush1.msra.mxu1 %v245_v20  ;;  %v225_v42 = vld [vmem:[#allocation8 + $0xa0] sm:$0xff]  ;;  %v247_v43 = vld [vmem:[#allocation8 + $0x150] sm:$0xff]  ;;  %v222_v44 = vld [vmem:[#allocation8 + $0x88] sm:$0xff] }
  0x67   :  { %1954 = vmatprep.subr.mxu0 %v2198_v0  ;;  %303 = vmatprep.subr.mxu1 %v242_v24  ;;  %v244_v45 = vld [vmem:[#allocation8 + $0x138] sm:$0xff]  ;;  %v221_v46 = vld [vmem:[#allocation8 + $0x80] sm:$0xff]  ;;  %v243_v47 = vld [vmem:[#allocation8 + $0x130] sm:$0xff] }
  0x68   :  { %1955 = vmatpush3.msra.mxu0 %v115_v19  ;;  %304 = vmatpush1.msra.mxu1 %v241_v26  ;;  %v218_v48 = vld [vmem:[#allocation8 + $0x68] sm:$0xff]  ;;  %v240_v49 = vld [vmem:[#allocation8 + $0x118] sm:$0xff]  ;;  %v217_v50 = vld [vmem:[#allocation8 + $0x60] sm:$0xff] }
  0x69   :  { %1957 = vmatmul.mubr.msk.f32.vlgmr.msra.gmra.mxu0 %vm130_vm1, %v114_v21  ;;  %362 = vmatprep.subr.mxu0 %v268_v22  ;;  %v239_v51 = vld [vmem:[#allocation8 + $0x110] sm:$0xff]  ;;  %v214_v52 = vld [vmem:[#allocation8 + $0x48] sm:$0xff]  ;;  %v236_v53 = vld [vmem:[#allocation8 + $0xf8] sm:$0xff] }
  0x6a   :  { %363 = vmatpush1.msra.mxu0 %v267_v23  ;;  %305 = vmatprep.subr.mxu1 %v238_v28  ;;  %v235_v54 = vld [vmem:[#allocation8 + $0xf0] sm:$0xff]  ;;  %v232_v55 = vld [vmem:[#allocation8 + $0xd8] sm:$0xff]  ;;  %v213_v1 = vld [vmem:[#allocation8 + $0x40] sm:$0xff] }
  0x6b   :  { %364 = vmatprep.subr.mxu0 %v264_v25  ;;  %306 = vmatpush1.msra.mxu1 %v237_v30  ;;  %v231_v56 = vld [vmem:[#allocation8 + $0xd0] sm:$0xff]  ;;  %v228_v57 = vld [vmem:[#allocation8 + $0xb8] sm:$0xff]  ;;  %v209_v4 = vld [vmem:[#allocation8 + $0x20] sm:$0xff] }
  0x6c   :  { %365 = vmatpush1.msra.mxu0 %v263_v27  ;;  %307 = vmatprep.subr.mxu1 %v234_v32  ;;  %v227_v58 = vld [vmem:[#allocation8 + $0xb0] sm:$0xff]  ;;  %v224_v59 = vld [vmem:[#allocation8 + $0x98] sm:$0xff]  ;;  %v206_v6 = vld [vmem:[#allocation8 + $0x8] sm:$0xff] }
  0x6d   :  { %366 = vmatprep.subr.mxu0 %v260_v29  ;;  %308 = vmatpush1.msra.mxu1 %v233_v34  ;;  %v223_v60 = vld [vmem:[#allocation8 + $0x90] sm:$0xff]  ;;  %v220_v61 = vld [vmem:[#allocation8 + $0x78] sm:$0xff]  ;;  %v205_v8 = vld [vmem:[#allocation8] sm:$0xff] }
  0x6e   :  { %367 = vmatpush1.msra.mxu0 %v259_v31  ;;  %309 = vmatprep.subr.mxu1 %v230_v36  ;;  %v219_v62 = vld [vmem:[#allocation8 + $0x70] sm:$0xff]  ;;  %v216_v63 = vld [vmem:[#allocation8 + $0x58] sm:$0xff]  ;;  %v577_v21 = vld [vmem:[#allocation11 + $0x460] sm:$0xff] }
  0x6f   :  { %368 = vmatprep.subr.mxu0 %v256_v33  ;;  %310 = vmatpush1.msra.mxu1 %v229_v38  ;;  %v215_v2 = vld [vmem:[#allocation8 + $0x50] sm:$0xff]  ;;  %v212_v3 = vld [vmem:[#allocation8 + $0x38] sm:$0xff]  ;;  %v897_v22 = vld [vmem:[#allocation11 + $0xe60] sm:$0xff] }
  0x70   :  { %369 = vmatpush1.msra.mxu0 %v255_v35  ;;  %311 = vmatprep.subr.mxu1 %v226_v40  ;;  %v211_v5 = vld [vmem:[#allocation8 + $0x30] sm:$0xff]  ;;  %v208_v7 = vld [vmem:[#allocation8 + $0x18] sm:$0xff]  ;;  %v557_v29 = vld [vmem:[#allocation11 + $0x3c0] sm:$0xff] }
  0x71   :  { %370 = vmatprep.subr.mxu0 %v252_v37  ;;  %312 = vmatpush1.msra.mxu1 %v225_v42  ;;  %v207_v9 = vld [vmem:[#allocation8 + $0x10] sm:$0xff]  ;;  %v588_v10 = vld [vmem:[#allocation11 + $0x4b8] sm:$0xff]  ;;  %v877_v30 = vld [vmem:[#allocation11 + $0xdc0] sm:$0xff] }
  0x72   :  { %371 = vmatpush1.msra.mxu0 %v251_v39  ;;  %313 = vmatprep.subr.mxu1 %v222_v44  ;;  %v908_v11 = vld [vmem:[#allocation11 + $0xeb8] sm:$0xff]  ;;  %v587_v17 = vld [vmem:[#allocation11 + $0x4b0] sm:$0xff]  ;;  %v578_v19 = vld [vmem:[#allocation11 + $0x468] sm:$0xff] }
  0x73   :  { %372 = vmatprep.subr.mxu0 %v248_v41  ;;  %314 = vmatpush1.msra.mxu1 %v221_v46  ;;  %v1929_v12 = vld [vmem:[#allocation7] ss:$0 sm:$0xff]  ;;  %v907_v18 = vld [vmem:[#allocation11 + $0xeb0] sm:$0xff]  ;;  %v898_v20 = vld [vmem:[#allocation11 + $0xe68] sm:$0xff] }
  0x74   :  { %373 = vmatpush1.msra.mxu0 %v247_v43  ;;  %315 = vmatprep.subr.mxu1 %v218_v48  ;;  %v568_v23 = vld [vmem:[#allocation11 + $0x418] sm:$0xff]  ;;  %v567_v25 = vld [vmem:[#allocation11 + $0x410] sm:$0xff]  ;;  %v558_v27 = vld [vmem:[#allocation11 + $0x3c8] sm:$0xff] }
  0x75   :  { %374 = vmatprep.subr.mxu0 %v244_v45  ;;  %316 = vmatpush1.msra.mxu1 %v217_v50  ;;  %v888_v24 = vld [vmem:[#allocation11 + $0xe18] sm:$0xff]  ;;  %v887_v26 = vld [vmem:[#allocation11 + $0xe10] sm:$0xff]  ;;  %v878_v28 = vld [vmem:[#allocation11 + $0xdc8] sm:$0xff] }
  0x76   :  { %375 = vmatpush1.msra.mxu0 %v243_v47  ;;  %317 = vmatprep.subr.mxu1 %v214_v52  ;;  %v548_v31 = vld [vmem:[#allocation11 + $0x378] sm:$0xff]  ;;  %v547_v33 = vld [vmem:[#allocation11 + $0x370] sm:$0xff]  ;;  %v538_v35 = vld [vmem:[#allocation11 + $0x328] sm:$0xff] }
  0x77   :  { %376 = vmatprep.subr.mxu0 %v240_v49  ;;  %426 = vmatprep.mubr.f32.mxu0 %v2198_v0  ;;  %v210_v0 = vld [vmem:[#allocation8 + $0x28] sm:$0xff]  ;;  %v868_v32 = vld [vmem:[#allocation11 + $0xd78] sm:$0xff]  ;;  %v867_v34 = vld [vmem:[#allocation11 + $0xd70] sm:$0xff] }
  0x78   :  { %377 = vmatpush1.msra.mxu0 %v239_v51  ;;  %318 = vmatpush1.msra.mxu1 %v213_v1  ;;  %v858_v36 = vld [vmem:[#allocation11 + $0xd28] sm:$0xff]  ;;  %v537_v37 = vld [vmem:[#allocation11 + $0x320] sm:$0xff]  ;;  %v528_v39 = vld [vmem:[#allocation11 + $0x2d8] sm:$0xff] }
  0x79   :  { %378 = vmatprep.subr.mxu0 %v236_v53  ;;  %319 = vmatprep.subr.mxu1 %v210_v0  ;;  %v857_v38 = vld [vmem:[#allocation11 + $0xd20] sm:$0xff]  ;;  %v848_v40 = vld [vmem:[#allocation11 + $0xcd8] sm:$0xff]  ;;  %v527_v41 = vld [vmem:[#allocation11 + $0x2d0] sm:$0xff] }
  0x7a   :  { %379 = vmatpush1.msra.mxu0 %v235_v54  ;;  %320 = vmatpush1.msra.mxu1 %v209_v4  ;;  %v847_v42 = vld [vmem:[#allocation11 + $0xcd0] sm:$0xff]  ;;  %v518_v43 = vld [vmem:[#allocation11 + $0x288] sm:$0xff]  ;;  %v517_v45 = vld [vmem:[#allocation11 + $0x280] sm:$0xff] }
  0x7b   :  { %380 = vmatprep.subr.mxu0 %v232_v55  ;;  %321 = vmatprep.subr.mxu1 %v206_v6  ;;  %v838_v44 = vld [vmem:[#allocation11 + $0xc88] sm:$0xff]  ;;  %v837_v46 = vld [vmem:[#allocation11 + $0xc80] sm:$0xff]  ;;  %v508_v47 = vld [vmem:[#allocation11 + $0x238] sm:$0xff] }
  0x7c   :  { %381 = vmatpush1.msra.mxu0 %v231_v56  ;;  %322 = vmatpush1.msra.mxu1 %v205_v8  ;;  %v828_v48 = vld [vmem:[#allocation11 + $0xc38] sm:$0xff]  ;;  %v507_v49 = vld [vmem:[#allocation11 + $0x230] sm:$0xff]  ;;  %v498_v51 = vld [vmem:[#allocation11 + $0x1e8] sm:$0xff] }
  0x7d   :  { %382 = vmatprep.subr.mxu0 %v228_v57  ;;  %1131 = vmatprep.subr.mxu1 %v588_v10  ;;  %v827_v50 = vld [vmem:[#allocation11 + $0xc30] sm:$0xff]  ;;  %v818_v52 = vld [vmem:[#allocation11 + $0xbe8] sm:$0xff]  ;;  %v497_v53 = vld [vmem:[#allocation11 + $0x1e0] sm:$0xff] }
  0x7e   :  { %383 = vmatpush1.msra.mxu0 %v227_v58  ;;  %v817_v54 = vld [vmem:[#allocation11 + $0xbe0] sm:$0xff]  ;;  %v488_v55 = vld [vmem:[#allocation11 + $0x198] sm:$0xff]  ;;  %v487_v57 = vld [vmem:[#allocation11 + $0x190] sm:$0xff] }
  0x7f   :  { %384 = vmatprep.subr.mxu0 %v224_v59  ;;  %v808_v56 = vld [vmem:[#allocation11 + $0xb98] sm:$0xff]  ;;  %v807_v58 = vld [vmem:[#allocation11 + $0xb90] sm:$0xff]  ;;  %v478_v59 = vld [vmem:[#allocation11 + $0x148] sm:$0xff] }
  0x80   :  { %385 = vmatpush1.msra.mxu0 %v223_v60  ;;  %v798_v60 = vld [vmem:[#allocation11 + $0xb48] sm:$0xff]  ;;  %v788_v1 = vld [vmem:[#allocation11 + $0xaf8] sm:$0xff]  ;;  %v787_v0 = vld [vmem:[#allocation11 + $0xaf0] sm:$0xff] }
  0x81   :  { %386 = vmatprep.subr.mxu0 %v220_v61  ;;  %v477_v61 = vld [vmem:[#allocation11 + $0x140] sm:$0xff]  ;;  %v778_v4 = vld [vmem:[#allocation11 + $0xaa8] sm:$0xff]  ;;  %v768_v8 = vld [vmem:[#allocation11 + $0xa58] sm:$0xff] }
  0x82   :  { %387 = vmatpush1.msra.mxu0 %v219_v62  ;;  %v797_v62 = vld [vmem:[#allocation11 + $0xb40] sm:$0xff]  ;;  %v767_v10 = vld [vmem:[#allocation11 + $0xa50] sm:$0xff] }
  0x83   :  { %388 = vmatprep.subr.mxu0 %v216_v63  ;;  %v468_v63 = vld [vmem:[#allocation11 + $0xf8] sm:$0xff]  ;;  %v777_v6 = vld [vmem:[#allocation11 + $0xaa0] sm:$0xff] }
  0x84   :  { %389 = vmatpush1.msra.mxu0 %v215_v2  ;;  %v467_v2 = vld [vmem:[#allocation11 + $0xf0] sm:$0xff] }
  0x85   :  { %390 = vmatprep.subr.mxu0 %v212_v3  ;;  %v458_v3 = vld [vmem:[#allocation11 + $0xa8] sm:$0xff] }
  0x86   :  { %391 = vmatpush1.msra.mxu0 %v211_v5  ;;  %v457_v5 = vld [vmem:[#allocation11 + $0xa0] sm:$0xff] }
  0x87   :  { %392 = vmatprep.subr.mxu0 %v208_v7  ;;  %v448_v7 = vld [vmem:[#allocation11 + $0x58] sm:$0xff] }
  0x88   :  { %393 = vmatpush1.msra.mxu0 %v207_v9  ;;  %v447_v9 = vld [vmem:[#allocation11 + $0x50] sm:$0xff] }
  0x89   :  { %1202 = vmatprep.subr.mxu0 %v908_v11  ;;  %v438_v11 = vld [vmem:[#allocation11 + $0x8] sm:$0xff] }
 0x129   :  { %v200_v13 = vpop.f32.mrf.mxu0 }
 0x12a   :  { %v201_v14 = vadd.f32 %v1929_v12, %v200_v13  ;;  %v758_v12 = vld [vmem:[#allocation11 + $0xa08] sm:$0xff]  ;;  %v437_v13 = vld [vmem:[#allocation11] sm:$0xff] }
 0x12b   :  { %v1958_v15 = vpop.f32.mrf.mxu0 }
 0x12c   :  { %v204_v16 = vmax.f32 %v201_v14, 0.0  ;;  %v757_v14 = vld [vmem:[#allocation11 + $0xa00] sm:$0xff]  ;;  %v748_v15 = vld [vmem:[#allocation11 + $0x9b8] sm:$0xff] }
 0x12e   :  { %356 = vmatmul.mubr.f32.vlgmr.msra.gmra.mxu1 %v204_v16  ;;  %427 = vmatmul.mubr.f32.vlgmr.msra.gmra.mxu0 %v204_v16  ;;  %v1068_v16 = vld [vmem:[#allocation11 + $0x13b8] sm:$0xff] }
 0x12f   :  { %1132 = vmatpush1.msra.mxu1 %v587_v17  ;;  %1203 = vmatpush1.msra.mxu0 %v907_v18  ;;  %v747_v17 = vld [vmem:[#allocation11 + $0x9b0] sm:$0xff] }
 0x130   :  { %1133 = vmatprep.subr.mxu1 %v578_v19  ;;  %1204 = vmatprep.subr.mxu0 %v898_v20  ;;  %v1067_v18 = vld [vmem:[#allocation11 + $0x13b0] sm:$0xff]  ;;  %v738_v19 = vld [vmem:[#allocation11 + $0x968] sm:$0xff] }
 0x131   :  { %1134 = vmatpush1.msra.mxu1 %v577_v21  ;;  %1205 = vmatpush1.msra.mxu0 %v897_v22  ;;  %v1058_v20 = vld [vmem:[#allocation11 + $0x1368] sm:$0xff]  ;;  %v737_v21 = vld [vmem:[#allocation11 + $0x960] sm:$0xff] }
 0x132   :  { %1135 = vmatprep.subr.mxu1 %v568_v23  ;;  %1206 = vmatprep.subr.mxu0 %v888_v24  ;;  %v1057_v22 = vld [vmem:[#allocation11 + $0x1360] sm:$0xff]  ;;  %v728_v23 = vld [vmem:[#allocation11 + $0x918] sm:$0xff] }
 0x133   :  { %1136 = vmatpush1.msra.mxu1 %v567_v25  ;;  %1207 = vmatpush1.msra.mxu0 %v887_v26  ;;  %v1048_v24 = vld [vmem:[#allocation11 + $0x1318] sm:$0xff]  ;;  %v727_v25 = vld [vmem:[#allocation11 + $0x910] sm:$0xff] }
 0x134   :  { %1137 = vmatprep.subr.mxu1 %v558_v27  ;;  %1208 = vmatprep.subr.mxu0 %v878_v28  ;;  %v1047_v26 = vld [vmem:[#allocation11 + $0x1310] sm:$0xff]  ;;  %v718_v27 = vld [vmem:[#allocation11 + $0x8c8] sm:$0xff] }
 0x135   :  { %1138 = vmatpush1.msra.mxu1 %v557_v29  ;;  %1209 = vmatpush1.msra.mxu0 %v877_v30  ;;  %v1038_v28 = vld [vmem:[#allocation11 + $0x12c8] sm:$0xff]  ;;  %v717_v29 = vld [vmem:[#allocation11 + $0x8c0] sm:$0xff] }
 0x136   :  { %1139 = vmatprep.subr.mxu1 %v548_v31  ;;  %1210 = vmatprep.subr.mxu0 %v868_v32  ;;  %v1037_v30 = vld [vmem:[#allocation11 + $0x12c0] sm:$0xff]  ;;  %v708_v31 = vld [vmem:[#allocation11 + $0x878] sm:$0xff] }
 0x137   :  { %1140 = vmatpush1.msra.mxu1 %v547_v33  ;;  %1211 = vmatpush1.msra.mxu0 %v867_v34  ;;  %v1028_v32 = vld [vmem:[#allocation11 + $0x1278] sm:$0xff]  ;;  %v707_v33 = vld [vmem:[#allocation11 + $0x870] sm:$0xff] }
 0x138   :  { %1141 = vmatprep.subr.mxu1 %v538_v35  ;;  %1212 = vmatprep.subr.mxu0 %v858_v36  ;;  %v1027_v34 = vld [vmem:[#allocation11 + $0x1270] sm:$0xff]  ;;  %v698_v35 = vld [vmem:[#allocation11 + $0x828] sm:$0xff] }
 0x139   :  { %1142 = vmatpush1.msra.mxu1 %v537_v37  ;;  %1213 = vmatpush1.msra.mxu0 %v857_v38  ;;  %v1018_v36 = vld [vmem:[#allocation11 + $0x1228] sm:$0xff]  ;;  %v697_v37 = vld [vmem:[#allocation11 + $0x820] sm:$0xff] }
 0x13a   :  { %1143 = vmatprep.subr.mxu1 %v528_v39  ;;  %1214 = vmatprep.subr.mxu0 %v848_v40  ;;  %v1017_v38 = vld [vmem:[#allocation11 + $0x1220] sm:$0xff]  ;;  %v688_v39 = vld [vmem:[#allocation11 + $0x7d8] sm:$0xff] }
 0x13b   :  { %1144 = vmatpush1.msra.mxu1 %v527_v41  ;;  %1215 = vmatpush1.msra.mxu0 %v847_v42  ;;  %v1008_v40 = vld [vmem:[#allocation11 + $0x11d8] sm:$0xff]  ;;  %v687_v41 = vld [vmem:[#allocation11 + $0x7d0] sm:$0xff] }
 0x13c   :  { %1145 = vmatprep.subr.mxu1 %v518_v43  ;;  %1216 = vmatprep.subr.mxu0 %v838_v44  ;;  %v1007_v42 = vld [vmem:[#allocation11 + $0x11d0] sm:$0xff]  ;;  %v678_v43 = vld [vmem:[#allocation11 + $0x788] sm:$0xff] }
 0x13d   :  { %1146 = vmatpush1.msra.mxu1 %v517_v45  ;;  %1217 = vmatpush1.msra.mxu0 %v837_v46  ;;  %v998_v44 = vld [vmem:[#allocation11 + $0x1188] sm:$0xff]  ;;  %v677_v45 = vld [vmem:[#allocation11 + $0x780] sm:$0xff] }
 0x13e   :  { %1147 = vmatprep.subr.mxu1 %v508_v47  ;;  %1218 = vmatprep.subr.mxu0 %v828_v48  ;;  %v997_v46 = vld [vmem:[#allocation11 + $0x1180] sm:$0xff]  ;;  %v668_v47 = vld [vmem:[#allocation11 + $0x738] sm:$0xff] }
 0x13f   :  { %1148 = vmatpush1.msra.mxu1 %v507_v49  ;;  %1219 = vmatpush1.msra.mxu0 %v827_v50  ;;  %v988_v48 = vld [vmem:[#allocation11 + $0x1138] sm:$0xff]  ;;  %v667_v49 = vld [vmem:[#allocation11 + $0x730] sm:$0xff] }
 0x140   :  { %1149 = vmatprep.subr.mxu1 %v498_v51  ;;  %1220 = vmatprep.subr.mxu0 %v818_v52  ;;  %v987_v50 = vld [vmem:[#allocation11 + $0x1130] sm:$0xff]  ;;  %v658_v51 = vld [vmem:[#allocation11 + $0x6e8] sm:$0xff] }
 0x141   :  { %1150 = vmatpush1.msra.mxu1 %v497_v53  ;;  %1221 = vmatpush1.msra.mxu0 %v817_v54  ;;  %v978_v52 = vld [vmem:[#allocation11 + $0x10e8] sm:$0xff]  ;;  %v657_v53 = vld [vmem:[#allocation11 + $0x6e0] sm:$0xff] }
 0x142   :  { %1151 = vmatprep.subr.mxu1 %v488_v55  ;;  %1222 = vmatprep.subr.mxu0 %v808_v56  ;;  %v977_v54 = vld [vmem:[#allocation11 + $0x10e0] sm:$0xff]  ;;  %v648_v55 = vld [vmem:[#allocation11 + $0x698] sm:$0xff] }
 0x143   :  { %1152 = vmatpush1.msra.mxu1 %v487_v57  ;;  %1223 = vmatpush1.msra.mxu0 %v807_v58  ;;  %v968_v56 = vld [vmem:[#allocation11 + $0x1098] sm:$0xff]  ;;  %v647_v57 = vld [vmem:[#allocation11 + $0x690] sm:$0xff] }
 0x144   :  { %1153 = vmatprep.subr.mxu1 %v478_v59  ;;  %1224 = vmatprep.subr.mxu0 %v798_v60  ;;  %v967_v58 = vld [vmem:[#allocation11 + $0x1090] sm:$0xff]  ;;  %v638_v59 = vld [vmem:[#allocation11 + $0x648] sm:$0xff] }
 0x145   :  { %1154 = vmatpush1.msra.mxu1 %v477_v61  ;;  %1225 = vmatpush1.msra.mxu0 %v797_v62  ;;  %v958_v60 = vld [vmem:[#allocation11 + $0x1048] sm:$0xff]  ;;  %v637_v61 = vld [vmem:[#allocation11 + $0x640] sm:$0xff] }
 0x146   :  { %1155 = vmatprep.subr.mxu1 %v468_v63  ;;  %1226 = vmatprep.subr.mxu0 %v788_v1  ;;  %v957_v62 = vld [vmem:[#allocation11 + $0x1040] sm:$0xff]  ;;  %v628_v63 = vld [vmem:[#allocation11 + $0x5f8] sm:$0xff] }
 0x147   :  { %1156 = vmatpush1.msra.mxu1 %v467_v2  ;;  %1227 = vmatpush1.msra.mxu0 %v787_v0  ;;  %v948_v1 = vld [vmem:[#allocation11 + $0xff8] sm:$0xff]  ;;  %v627_v2 = vld [vmem:[#allocation11 + $0x5f0] sm:$0xff] }
 0x148   :  { %1157 = vmatprep.subr.mxu1 %v458_v3  ;;  %1228 = vmatprep.subr.mxu0 %v778_v4  ;;  %v947_v0 = vld [vmem:[#allocation11 + $0xff0] sm:$0xff]  ;;  %v618_v3 = vld [vmem:[#allocation11 + $0x5a8] sm:$0xff] }
 0x149   :  { %1158 = vmatpush1.msra.mxu1 %v457_v5  ;;  %1229 = vmatpush1.msra.mxu0 %v777_v6  ;;  %v938_v4 = vld [vmem:[#allocation11 + $0xfa8] sm:$0xff]  ;;  %v617_v5 = vld [vmem:[#allocation11 + $0x5a0] sm:$0xff] }
 0x14a   :  { %1159 = vmatprep.subr.mxu1 %v448_v7  ;;  %1230 = vmatprep.subr.mxu0 %v768_v8  ;;  %v937_v6 = vld [vmem:[#allocation11 + $0xfa0] sm:$0xff]  ;;  %v608_v7 = vld [vmem:[#allocation11 + $0x558] sm:$0xff] }
 0x14b   :  { %1160 = vmatpush1.msra.mxu1 %v447_v9  ;;  %1231 = vmatpush1.msra.mxu0 %v767_v10  ;;  %v928_v8 = vld [vmem:[#allocation11 + $0xf58] sm:$0xff]  ;;  %v607_v9 = vld [vmem:[#allocation11 + $0x550] sm:$0xff] }
 0x14c   :  { %1161 = vmatprep.subr.mxu1 %v438_v11  ;;  %1232 = vmatprep.subr.mxu0 %v758_v12  ;;  %v927_v10 = vld [vmem:[#allocation11 + $0xf50] sm:$0xff]  ;;  %v598_v11 = vld [vmem:[#allocation11 + $0x508] sm:$0xff] }
 0x14d   :  { %1162 = vmatpush1.msra.mxu1 %v437_v13  ;;  %1233 = vmatpush1.msra.mxu0 %v757_v14  ;;  %v918_v12 = vld [vmem:[#allocation11 + $0xf08] sm:$0xff]  ;;  %v597_v13 = vld [vmem:[#allocation11 + $0x500] sm:$0xff] }
 0x14e   :  { %1163 = vmatprep.subr.mxu1 %v748_v15  ;;  %1234 = vmatprep.subr.mxu0 %v1068_v16  ;;  %v917_v14 = vld [vmem:[#allocation11 + $0xf00] sm:$0xff]  ;;  %v590_v15 = vld [vmem:[#allocation11 + $0x4c8] sm:$0xff] }
 0x14f   :  { %1164 = vmatpush2.msra.mxu1 %v747_v17  ;;  %1235 = vmatpush2.msra.mxu0 %v1067_v18  ;;  %v910_v16 = vld [vmem:[#allocation11 + $0xec8] sm:$0xff]  ;;  %v271_v17 = vlaneseq }
 0x150   :  { %1165 = vmatprep.subr.mxu1 %v738_v19  ;;  %1236 = vmatprep.subr.mxu0 %v1058_v20 }
 0x151   :  { %1166 = vmatpush2.msra.mxu1 %v737_v21  ;;  %1237 = vmatpush2.msra.mxu0 %v1057_v22  ;;  %v2273_v18 = vshrl.u32 %v271_v17, 7  ;;  %v269_v21 = vld [vmem:[#allocation10] sm:$0xf]  ;;  %v809_v17 = vld [vmem:[#allocation11 + $0xba0] sm:$0xff] }
 0x152   :  { %1167 = vmatprep.subr.mxu1 %v728_v23  ;;  %1238 = vmatprep.subr.mxu0 %v1048_v24 }
 0x153   :  { %1168 = vmatpush2.msra.mxu1 %v727_v25  ;;  %1239 = vmatpush2.msra.mxu0 %v1047_v26  ;;  %v2276_v19 = vsub.s32 0, %v2273_v18  ;;  %v281_v20 = vsub.s32 2, %v2273_v18  ;;  %v2280_v22 = vsub.s32 1, %v2273_v18  ;;  %v285_v23 = vsub.s32 3, %v2273_v18 }
 0x154   :  { %1169 = vmatprep.subr.mxu1 %v718_v27  ;;  %1240 = vmatprep.subr.mxu0 %v1038_v28 }
 0x155   :  { %1170 = vmatpush2.msra.mxu1 %v717_v29  ;;  %1241 = vmatpush2.msra.mxu0 %v1037_v30  ;;  %v274_v24 = vrot.slane %v269_v21, %v2276_v19  ;;  %v282_v25 = vrot.slane %v269_v21, %v281_v20  ;;  %v278_v26 = vrot.slane %v269_v21, %v2280_v22 }
 0x156   :  { %1171 = vmatprep.subr.mxu1 %v708_v31  ;;  %1242 = vmatprep.subr.mxu0 %v1028_v32  ;;  %v286_v27 = vrot.slane %v269_v21, %v285_v23  ;;  %v480_v21 = vld [vmem:[#allocation11 + $0x158] sm:$0xff] }
 0x157   :  { %1172 = vmatpush2.msra.mxu1 %v707_v33  ;;  %1243 = vmatpush2.msra.mxu0 %v1027_v34 }
 0x158   :  { %1173 = vmatprep.subr.mxu1 %v698_v35  ;;  %1244 = vmatprep.subr.mxu0 %v1018_v36 }
 0x159   :  { %1174 = vmatpush2.msra.mxu1 %v697_v37  ;;  %1245 = vmatpush2.msra.mxu0 %v1017_v38 }
 0x15a   :  { %1175 = vmatprep.subr.mxu1 %v688_v39  ;;  %1246 = vmatprep.subr.mxu0 %v1008_v40  ;;  %v589_v40 = vld [vmem:[#allocation11 + $0x4c0] sm:$0xff] }
 0x15b   :  { %1176 = vmatpush2.msra.mxu1 %v687_v41  ;;  %1247 = vmatpush2.msra.mxu0 %v1007_v42  ;;  %v909_v41 = vld [vmem:[#allocation11 + $0xec0] sm:$0xff]  ;;  %v580_v42 = vld [vmem:[#allocation11 + $0x478] sm:$0xff] }
 0x15c   :  { %1177 = vmatprep.subr.mxu1 %v678_v43  ;;  %1248 = vmatprep.subr.mxu0 %v998_v44  ;;  %v900_v43 = vld [vmem:[#allocation11 + $0xe78] sm:$0xff]  ;;  %v579_v44 = vld [vmem:[#allocation11 + $0x470] sm:$0xff] }
 0x15d   :  { %1178 = vmatpush2.msra.mxu1 %v677_v45  ;;  %1249 = vmatpush2.msra.mxu0 %v997_v46  ;;  %v899_v45 = vld [vmem:[#allocation11 + $0xe70] sm:$0xff]  ;;  %v570_v46 = vld [vmem:[#allocation11 + $0x428] sm:$0xff] }
 0x15e   :  { %1179 = vmatprep.subr.mxu1 %v668_v47  ;;  %1250 = vmatprep.subr.mxu0 %v988_v48  ;;  %v890_v47 = vld [vmem:[#allocation11 + $0xe28] sm:$0xff]  ;;  %v569_v48 = vld [vmem:[#allocation11 + $0x420] sm:$0xff] }
 0x15f   :  { %1180 = vmatpush2.msra.mxu1 %v667_v49  ;;  %1251 = vmatpush2.msra.mxu0 %v987_v50  ;;  %v889_v49 = vld [vmem:[#allocation11 + $0xe20] sm:$0xff]  ;;  %v560_v50 = vld [vmem:[#allocation11 + $0x3d8] sm:$0xff] }
 0x160   :  { %1181 = vmatprep.subr.mxu1 %v658_v51  ;;  %1252 = vmatprep.subr.mxu0 %v978_v52  ;;  %v880_v51 = vld [vmem:[#allocation11 + $0xdd8] sm:$0xff]  ;;  %v559_v52 = vld [vmem:[#allocation11 + $0x3d0] sm:$0xff] }
 0x161   :  { %1182 = vmatpush2.msra.mxu1 %v657_v53  ;;  %1253 = vmatpush2.msra.mxu0 %v977_v54  ;;  %v879_v53 = vld [vmem:[#allocation11 + $0xdd0] sm:$0xff]  ;;  %v550_v54 = vld [vmem:[#allocation11 + $0x388] sm:$0xff] }
 0x162   :  { %1183 = vmatprep.subr.mxu1 %v648_v55  ;;  %1254 = vmatprep.subr.mxu0 %v968_v56  ;;  %v870_v55 = vld [vmem:[#allocation11 + $0xd88] sm:$0xff]  ;;  %v549_v56 = vld [vmem:[#allocation11 + $0x380] sm:$0xff] }
 0x163   :  { %1184 = vmatpush2.msra.mxu1 %v647_v57  ;;  %1255 = vmatpush2.msra.mxu0 %v967_v58  ;;  %v869_v57 = vld [vmem:[#allocation11 + $0xd80] sm:$0xff]  ;;  %v540_v58 = vld [vmem:[#allocation11 + $0x338] sm:$0xff] }
 0x164   :  { %1185 = vmatprep.subr.mxu1 %v638_v59  ;;  %1256 = vmatprep.subr.mxu0 %v958_v60  ;;  %v860_v59 = vld [vmem:[#allocation11 + $0xd38] sm:$0xff]  ;;  %v539_v60 = vld [vmem:[#allocation11 + $0x330] sm:$0xff] }
 0x165   :  { %1186 = vmatpush2.msra.mxu1 %v637_v61  ;;  %1257 = vmatpush2.msra.mxu0 %v957_v62  ;;  %v859_v61 = vld [vmem:[#allocation11 + $0xd30] sm:$0xff]  ;;  %v530_v62 = vld [vmem:[#allocation11 + $0x2e8] sm:$0xff] }
 0x166   :  { %1187 = vmatprep.subr.mxu1 %v628_v63  ;;  %1258 = vmatprep.subr.mxu0 %v948_v1  ;;  %v850_v63 = vld [vmem:[#allocation11 + $0xce8] sm:$0xff]  ;;  %v529_v1 = vld [vmem:[#allocation11 + $0x2e0] sm:$0xff] }
 0x167   :  { %1188 = vmatpush2.msra.mxu1 %v627_v2  ;;  %1259 = vmatpush2.msra.mxu0 %v947_v0  ;;  %v849_v2 = vld [vmem:[#allocation11 + $0xce0] sm:$0xff]  ;;  %v520_v0 = vld [vmem:[#allocation11 + $0x298] sm:$0xff] }
 0x168   :  { %1189 = vmatprep.subr.mxu1 %v618_v3  ;;  %1260 = vmatprep.subr.mxu0 %v938_v4  ;;  %v840_v3 = vld [vmem:[#allocation11 + $0xc98] sm:$0xff]  ;;  %v519_v4 = vld [vmem:[#allocation11 + $0x290] sm:$0xff] }
 0x169   :  { %1190 = vmatpush2.msra.mxu1 %v617_v5  ;;  %1261 = vmatpush2.msra.mxu0 %v937_v6  ;;  %v839_v5 = vld [vmem:[#allocation11 + $0xc90] sm:$0xff]  ;;  %v510_v6 = vld [vmem:[#allocation11 + $0x248] sm:$0xff] }
 0x16a   :  { %1191 = vmatprep.subr.mxu1 %v608_v7  ;;  %1262 = vmatprep.subr.mxu0 %v928_v8  ;;  %v830_v7 = vld [vmem:[#allocation11 + $0xc48] sm:$0xff]  ;;  %v509_v8 = vld [vmem:[#allocation11 + $0x240] sm:$0xff] }
 0x16b   :  { %1192 = vmatpush2.msra.mxu1 %v607_v9  ;;  %1263 = vmatpush2.msra.mxu0 %v927_v10  ;;  %v829_v9 = vld [vmem:[#allocation11 + $0xc40] sm:$0xff]  ;;  %v500_v10 = vld [vmem:[#allocation11 + $0x1f8] sm:$0xff] }
 0x16c   :  { %1193 = vmatprep.subr.mxu1 %v598_v11  ;;  %1264 = vmatprep.subr.mxu0 %v918_v12  ;;  %v820_v11 = vld [vmem:[#allocation11 + $0xbf8] sm:$0xff]  ;;  %v499_v12 = vld [vmem:[#allocation11 + $0x1f0] sm:$0xff] }
 0x16d   :  { %1194 = vmatpush2.msra.mxu1 %v597_v13  ;;  %1265 = vmatpush2.msra.mxu0 %v917_v14  ;;  %v819_v13 = vld [vmem:[#allocation11 + $0xbf0] sm:$0xff]  ;;  %v490_v14 = vld [vmem:[#allocation11 + $0x1a8] sm:$0xff] }
 0x16e   :  { %1273 = vmatprep.subr.mxu1 %v590_v15  ;;  %1344 = vmatprep.subr.mxu0 %v910_v16  ;;  %v810_v15 = vld [vmem:[#allocation11 + $0xba8] sm:$0xff]  ;;  %v489_v16 = vld [vmem:[#allocation11 + $0x1a0] sm:$0xff] }
 0x1ee   :  { %v357_v28 = vpop.f32.mrf.mxu1  ;;  %v428_v29 = vpop.f32.mrf.mxu0 }
 0x1ef   :  { %v358_v30 = vadd.f32 %v357_v28, %v274_v24  ;;  %v429_v31 = vadd.f32 %v428_v29, %v282_v25  ;;  %v800_v24 = vld [vmem:[#allocation11 + $0xb58] sm:$0xff]  ;;  %v479_v25 = vld [vmem:[#allocation11 + $0x150] sm:$0xff]  ;;  %v790_v28 = vld [vmem:[#allocation11 + $0xb08] sm:$0xff] }
 0x1f0   :  { %v359_v32 = vpop.f32.mrf.mxu1  ;;  %v430_v33 = vpop.f32.mrf.mxu0  ;;  %v469_v29 = vld [vmem:[#allocation11 + $0x100] sm:$0xff] }
 0x1f1   :  { %v360_v34 = vadd.f32 %v359_v32, %v278_v26  ;;  %v431_v35 = vadd.f32 %v430_v33, %v286_v27  ;;  %v2293_v38 = vmax.f32 %v358_v30, 0.0  ;;  %v2295_v39 = vmax.f32 %v429_v31, 0.0  ;;  %v799_v26 = vld [vmem:[#allocation11 + $0xb50] sm:$0xff]  ;;  %v470_v27 = vld [vmem:[#allocation11 + $0x108] sm:$0xff]  ;;  %v789_v30 = vld [vmem:[#allocation11 + $0xb00] sm:$0xff] }
 0x1f2   :  { %v460_v31 = vld [vmem:[#allocation11 + $0xb8] sm:$0xff]  ;;  %v459_v33 = vld [vmem:[#allocation11 + $0xb0] sm:$0xff] }
 0x1f3   :  { %v2289_v36 = vmax.f32 %v360_v34, 0.0  ;;  %v2291_v37 = vmax.f32 %v431_v35, 0.0  ;;  %v780_v32 = vld [vmem:[#allocation11 + $0xab8] sm:$0xff]  ;;  %v779_v34 = vld [vmem:[#allocation11 + $0xab0] sm:$0xff]  ;;  %v450_v35 = vld [vmem:[#allocation11 + $0x68] sm:$0xff] }
 0x1f5   :  { %1195 = vmatprep.mubr.f32.mxu1 %v2289_v36  ;;  %1266 = vmatprep.mubr.f32.mxu0 %v2291_v37 }
 0x1f6   :  { %1196 = vmatmul.mubr.f32.vlgmr.msra.gmra.mxu1 %v2293_v38  ;;  %1267 = vmatmul.mubr.f32.vlgmr.msra.gmra.mxu0 %v2295_v39 }
 0x1f7   :  { %1274 = vmatpush1.msra.mxu1 %v589_v40  ;;  %1345 = vmatpush1.msra.mxu0 %v909_v41  ;;  %v770_v40 = vld [vmem:[#allocation11 + $0xa68] sm:$0xff]  ;;  %v449_v41 = vld [vmem:[#allocation11 + $0x60] sm:$0xff] }
 0x1f8   :  { %1275 = vmatprep.subr.mxu1 %v580_v42  ;;  %1337 = vmatprep.mubr.f32.mxu1 %v2289_v36  ;;  %v769_v42 = vld [vmem:[#allocation11 + $0xa60] sm:$0xff] }
 0x1f9   :  { %1346 = vmatprep.subr.mxu0 %v900_v43  ;;  %1408 = vmatprep.mubr.f32.mxu0 %v2291_v37  ;;  %v440_v43 = vld [vmem:[#allocation11 + $0x18] sm:$0xff] }
 0x1fa   :  { %1276 = vmatpush1.msra.mxu1 %v579_v44  ;;  %1347 = vmatpush1.msra.mxu0 %v899_v45  ;;  %v760_v44 = vld [vmem:[#allocation11 + $0xa18] sm:$0xff]  ;;  %v439_v45 = vld [vmem:[#allocation11 + $0x10] sm:$0xff] }
 0x1fb   :  { %1277 = vmatprep.subr.mxu1 %v570_v46  ;;  %1348 = vmatprep.subr.mxu0 %v890_v47  ;;  %v759_v46 = vld [vmem:[#allocation11 + $0xa10] sm:$0xff]  ;;  %v750_v47 = vld [vmem:[#allocation11 + $0x9c8] sm:$0xff] }
 0x1fc   :  { %1278 = vmatpush1.msra.mxu1 %v569_v48  ;;  %1349 = vmatpush1.msra.mxu0 %v889_v49  ;;  %v1070_v48 = vld [vmem:[#allocation11 + $0x13c8] sm:$0xff]  ;;  %v749_v49 = vld [vmem:[#allocation11 + $0x9c0] sm:$0xff] }
 0x1fd   :  { %1279 = vmatprep.subr.mxu1 %v560_v50  ;;  %1350 = vmatprep.subr.mxu0 %v880_v51  ;;  %v1069_v50 = vld [vmem:[#allocation11 + $0x13c0] sm:$0xff]  ;;  %v740_v51 = vld [vmem:[#allocation11 + $0x978] sm:$0xff] }
 0x1fe   :  { %1280 = vmatpush1.msra.mxu1 %v559_v52  ;;  %1351 = vmatpush1.msra.mxu0 %v879_v53  ;;  %v1060_v52 = vld [vmem:[#allocation11 + $0x1378] sm:$0xff]  ;;  %v739_v53 = vld [vmem:[#allocation11 + $0x970] sm:$0xff] }
 0x1ff   :  { %1281 = vmatprep.subr.mxu1 %v550_v54  ;;  %1352 = vmatprep.subr.mxu0 %v870_v55  ;;  %v1059_v54 = vld [vmem:[#allocation11 + $0x1370] sm:$0xff]  ;;  %v730_v55 = vld [vmem:[#allocation11 + $0x928] sm:$0xff] }
 0x200   :  { %1282 = vmatpush1.msra.mxu1 %v549_v56  ;;  %1353 = vmatpush1.msra.mxu0 %v869_v57  ;;  %v1050_v56 = vld [vmem:[#allocation11 + $0x1328] sm:$0xff]  ;;  %v729_v57 = vld [vmem:[#allocation11 + $0x920] sm:$0xff] }
 0x201   :  { %1283 = vmatprep.subr.mxu1 %v540_v58  ;;  %1354 = vmatprep.subr.mxu0 %v860_v59  ;;  %v1049_v58 = vld [vmem:[#allocation11 + $0x1320] sm:$0xff]  ;;  %v720_v59 = vld [vmem:[#allocation11 + $0x8d8] sm:$0xff] }
 0x202   :  { %1284 = vmatpush1.msra.mxu1 %v539_v60  ;;  %1355 = vmatpush1.msra.mxu0 %v859_v61  ;;  %v1040_v60 = vld [vmem:[#allocation11 + $0x12d8] sm:$0xff]  ;;  %v719_v61 = vld [vmem:[#allocation11 + $0x8d0] sm:$0xff] }
 0x203   :  { %1285 = vmatprep.subr.mxu1 %v530_v62  ;;  %1356 = vmatprep.subr.mxu0 %v850_v63  ;;  %v1039_v62 = vld [vmem:[#allocation11 + $0x12d0] sm:$0xff]  ;;  %v710_v63 = vld [vmem:[#allocation11 + $0x888] sm:$0xff] }
 0x204   :  { %1286 = vmatpush1.msra.mxu1 %v529_v1  ;;  %1357 = vmatpush1.msra.mxu0 %v849_v2  ;;  %v1030_v1 = vld [vmem:[#allocation11 + $0x1288] sm:$0xff]  ;;  %v709_v2 = vld [vmem:[#allocation11 + $0x880] sm:$0xff] }
 0x205   :  { %1287 = vmatprep.subr.mxu1 %v520_v0  ;;  %1358 = vmatprep.subr.mxu0 %v840_v3  ;;  %v1029_v0 = vld [vmem:[#allocation11 + $0x1280] sm:$0xff]  ;;  %v700_v3 = vld [vmem:[#allocation11 + $0x838] sm:$0xff] }
 0x206   :  { %1288 = vmatpush1.msra.mxu1 %v519_v4  ;;  %1359 = vmatpush1.msra.mxu0 %v839_v5  ;;  %v1020_v4 = vld [vmem:[#allocation11 + $0x1238] sm:$0xff]  ;;  %v699_v5 = vld [vmem:[#allocation11 + $0x830] sm:$0xff] }
 0x207   :  { %1289 = vmatprep.subr.mxu1 %v510_v6  ;;  %1360 = vmatprep.subr.mxu0 %v830_v7  ;;  %v1019_v6 = vld [vmem:[#allocation11 + $0x1230] sm:$0xff]  ;;  %v690_v7 = vld [vmem:[#allocation11 + $0x7e8] sm:$0xff] }
 0x208   :  { %1290 = vmatpush1.msra.mxu1 %v509_v8  ;;  %1361 = vmatpush1.msra.mxu0 %v829_v9  ;;  %v1010_v8 = vld [vmem:[#allocation11 + $0x11e8] sm:$0xff]  ;;  %v689_v9 = vld [vmem:[#allocation11 + $0x7e0] sm:$0xff] }
 0x209   :  { %1291 = vmatprep.subr.mxu1 %v500_v10  ;;  %1362 = vmatprep.subr.mxu0 %v820_v11  ;;  %v1009_v10 = vld [vmem:[#allocation11 + $0x11e0] sm:$0xff]  ;;  %v680_v11 = vld [vmem:[#allocation11 + $0x798] sm:$0xff] }
 0x20a   :  { %1292 = vmatpush1.msra.mxu1 %v499_v12  ;;  %1363 = vmatpush1.msra.mxu0 %v819_v13  ;;  %v1000_v12 = vld [vmem:[#allocation11 + $0x1198] sm:$0xff]  ;;  %v679_v13 = vld [vmem:[#allocation11 + $0x790] sm:$0xff] }
 0x20b   :  { %1293 = vmatprep.subr.mxu1 %v490_v14  ;;  %1364 = vmatprep.subr.mxu0 %v810_v15  ;;  %v999_v14 = vld [vmem:[#allocation11 + $0x1190] sm:$0xff]  ;;  %v670_v15 = vld [vmem:[#allocation11 + $0x748] sm:$0xff] }
 0x20c   :  { %1294 = vmatpush1.msra.mxu1 %v489_v16  ;;  %1365 = vmatpush1.msra.mxu0 %v809_v17  ;;  %v990_v16 = vld [vmem:[#allocation11 + $0x1148] sm:$0xff]  ;;  %v669_v17 = vld [vmem:[#allocation11 + $0x740] sm:$0xff] }
 0x20d   :  { %1295 = vmatprep.subr.mxu1 %v480_v21  ;;  %1366 = vmatprep.subr.mxu0 %v800_v24  ;;  %v989_v21 = vld [vmem:[#allocation11 + $0x1140] sm:$0xff]  ;;  %v660_v24 = vld [vmem:[#allocation11 + $0x6f8] sm:$0xff] }
 0x20e   :  { %1296 = vmatpush1.msra.mxu1 %v479_v25  ;;  %1367 = vmatpush1.msra.mxu0 %v799_v26  ;;  %v980_v25 = vld [vmem:[#allocation11 + $0x10f8] sm:$0xff]  ;;  %v659_v26 = vld [vmem:[#allocation11 + $0x6f0] sm:$0xff] }
 0x20f   :  { %1297 = vmatprep.subr.mxu1 %v470_v27  ;;  %1368 = vmatprep.subr.mxu0 %v790_v28  ;;  %v979_v27 = vld [vmem:[#allocation11 + $0x10f0] sm:$0xff]  ;;  %v650_v28 = vld [vmem:[#allocation11 + $0x6a8] sm:$0xff] }
 0x210   :  { %1298 = vmatpush1.msra.mxu1 %v469_v29  ;;  %1369 = vmatpush1.msra.mxu0 %v789_v30  ;;  %v970_v29 = vld [vmem:[#allocation11 + $0x10a8] sm:$0xff]  ;;  %v649_v30 = vld [vmem:[#allocation11 + $0x6a0] sm:$0xff] }
 0x211   :  { %1299 = vmatprep.subr.mxu1 %v460_v31  ;;  %1370 = vmatprep.subr.mxu0 %v780_v32  ;;  %v969_v31 = vld [vmem:[#allocation11 + $0x10a0] sm:$0xff]  ;;  %v640_v32 = vld [vmem:[#allocation11 + $0x658] sm:$0xff] }
 0x212   :  { %1300 = vmatpush1.msra.mxu1 %v459_v33  ;;  %1371 = vmatpush1.msra.mxu0 %v779_v34  ;;  %v960_v33 = vld [vmem:[#allocation11 + $0x1058] sm:$0xff]  ;;  %v639_v34 = vld [vmem:[#allocation11 + $0x650] sm:$0xff] }
 0x213   :  { %1301 = vmatprep.subr.mxu1 %v450_v35  ;;  %1372 = vmatprep.subr.mxu0 %v770_v40  ;;  %v959_v35 = vld [vmem:[#allocation11 + $0x1050] sm:$0xff]  ;;  %v630_v40 = vld [vmem:[#allocation11 + $0x608] sm:$0xff] }
 0x214   :  { %1302 = vmatpush1.msra.mxu1 %v449_v41  ;;  %1373 = vmatpush1.msra.mxu0 %v769_v42  ;;  %v950_v41 = vld [vmem:[#allocation11 + $0x1008] sm:$0xff]  ;;  %v629_v42 = vld [vmem:[#allocation11 + $0x600] sm:$0xff] }
 0x215   :  { %1303 = vmatprep.subr.mxu1 %v440_v43  ;;  %1374 = vmatprep.subr.mxu0 %v760_v44  ;;  %v949_v43 = vld [vmem:[#allocation11 + $0x1000] sm:$0xff]  ;;  %v620_v44 = vld [vmem:[#allocation11 + $0x5b8] sm:$0xff] }
 0x216   :  { %1304 = vmatpush1.msra.mxu1 %v439_v45  ;;  %1375 = vmatpush1.msra.mxu0 %v759_v46  ;;  %v940_v45 = vld [vmem:[#allocation11 + $0xfb8] sm:$0xff]  ;;  %v619_v46 = vld [vmem:[#allocation11 + $0x5b0] sm:$0xff] }
 0x217   :  { %1305 = vmatprep.subr.mxu1 %v750_v47  ;;  %1376 = vmatprep.subr.mxu0 %v1070_v48  ;;  %v939_v47 = vld [vmem:[#allocation11 + $0xfb0] sm:$0xff]  ;;  %v610_v48 = vld [vmem:[#allocation11 + $0x568] sm:$0xff] }
 0x218   :  { %1306 = vmatpush2.msra.mxu1 %v749_v49  ;;  %1377 = vmatpush2.msra.mxu0 %v1069_v50  ;;  %v930_v49 = vld [vmem:[#allocation11 + $0xf68] sm:$0xff]  ;;  %v609_v50 = vld [vmem:[#allocation11 + $0x560] sm:$0xff] }
 0x219   :  { %1307 = vmatprep.subr.mxu1 %v740_v51  ;;  %1378 = vmatprep.subr.mxu0 %v1060_v52  ;;  %v929_v51 = vld [vmem:[#allocation11 + $0xf60] sm:$0xff]  ;;  %v600_v52 = vld [vmem:[#allocation11 + $0x518] sm:$0xff] }
 0x21a   :  { %1308 = vmatpush2.msra.mxu1 %v739_v53  ;;  %1379 = vmatpush2.msra.mxu0 %v1059_v54  ;;  %v920_v53 = vld [vmem:[#allocation11 + $0xf18] sm:$0xff]  ;;  %v599_v54 = vld [vmem:[#allocation11 + $0x510] sm:$0xff] }
 0x21b   :  { %1309 = vmatprep.subr.mxu1 %v730_v55  ;;  %1380 = vmatprep.subr.mxu0 %v1050_v56  ;;  %v919_v55 = vld [vmem:[#allocation11 + $0xf10] sm:$0xff]  ;;  %v592_v56 = vld [vmem:[#allocation11 + $0x4d8] sm:$0xff] }
 0x21c   :  { %1310 = vmatpush2.msra.mxu1 %v729_v57  ;;  %1381 = vmatpush2.msra.mxu0 %v1049_v58  ;;  %v912_v57 = vld [vmem:[#allocation11 + $0xed8] sm:$0xff]  ;;  %v591_v58 = vld [vmem:[#allocation11 + $0x4d0] sm:$0xff] }
 0x21d   :  { %1311 = vmatprep.subr.mxu1 %v720_v59  ;;  %1382 = vmatprep.subr.mxu0 %v1040_v60  ;;  %v911_v59 = vld [vmem:[#allocation11 + $0xed0] sm:$0xff]  ;;  %v582_v60 = vld [vmem:[#allocation11 + $0x488] sm:$0xff] }
 0x21e   :  { %1312 = vmatpush2.msra.mxu1 %v719_v61  ;;  %1383 = vmatpush2.msra.mxu0 %v1039_v62  ;;  %v902_v61 = vld [vmem:[#allocation11 + $0xe88] sm:$0xff]  ;;  %v581_v62 = vld [vmem:[#allocation11 + $0x480] sm:$0xff] }
 0x21f   :  { %1313 = vmatprep.subr.mxu1 %v710_v63  ;;  %1384 = vmatprep.subr.mxu0 %v1030_v1  ;;  %v901_v63 = vld [vmem:[#allocation11 + $0xe80] sm:$0xff]  ;;  %v572_v1 = vld [vmem:[#allocation11 + $0x438] sm:$0xff] }
 0x220   :  { %1314 = vmatpush2.msra.mxu1 %v709_v2  ;;  %1385 = vmatpush2.msra.mxu0 %v1029_v0  ;;  %v892_v2 = vld [vmem:[#allocation11 + $0xe38] sm:$0xff]  ;;  %v571_v0 = vld [vmem:[#allocation11 + $0x430] sm:$0xff] }
 0x221   :  { %1315 = vmatprep.subr.mxu1 %v700_v3  ;;  %1386 = vmatprep.subr.mxu0 %v1020_v4  ;;  %v891_v3 = vld [vmem:[#allocation11 + $0xe30] sm:$0xff]  ;;  %v562_v4 = vld [vmem:[#allocation11 + $0x3e8] sm:$0xff] }
 0x222   :  { %1316 = vmatpush2.msra.mxu1 %v699_v5  ;;  %1387 = vmatpush2.msra.mxu0 %v1019_v6  ;;  %v882_v5 = vld [vmem:[#allocation11 + $0xde8] sm:$0xff]  ;;  %v561_v6 = vld [vmem:[#allocation11 + $0x3e0] sm:$0xff] }
 0x223   :  { %1317 = vmatprep.subr.mxu1 %v690_v7  ;;  %1388 = vmatprep.subr.mxu0 %v1010_v8  ;;  %v881_v7 = vld [vmem:[#allocation11 + $0xde0] sm:$0xff]  ;;  %v552_v8 = vld [vmem:[#allocation11 + $0x398] sm:$0xff] }
 0x224   :  { %1318 = vmatpush2.msra.mxu1 %v689_v9  ;;  %1389 = vmatpush2.msra.mxu0 %v1009_v10  ;;  %v872_v9 = vld [vmem:[#allocation11 + $0xd98] sm:$0xff]  ;;  %v551_v10 = vld [vmem:[#allocation11 + $0x390] sm:$0xff] }
 0x225   :  { %1319 = vmatprep.subr.mxu1 %v680_v11  ;;  %1390 = vmatprep.subr.mxu0 %v1000_v12  ;;  %v871_v11 = vld [vmem:[#allocation11 + $0xd90] sm:$0xff]  ;;  %v542_v12 = vld [vmem:[#allocation11 + $0x348] sm:$0xff] }
 0x226   :  { %1320 = vmatpush2.msra.mxu1 %v679_v13  ;;  %1391 = vmatpush2.msra.mxu0 %v999_v14  ;;  %v862_v13 = vld [vmem:[#allocation11 + $0xd48] sm:$0xff]  ;;  %v541_v14 = vld [vmem:[#allocation11 + $0x340] sm:$0xff] }
 0x227   :  { %1321 = vmatprep.subr.mxu1 %v670_v15  ;;  %1392 = vmatprep.subr.mxu0 %v990_v16  ;;  %v861_v15 = vld [vmem:[#allocation11 + $0xd40] sm:$0xff]  ;;  %v532_v16 = vld [vmem:[#allocation11 + $0x2f8] sm:$0xff] }
 0x228   :  { %1322 = vmatpush2.msra.mxu1 %v669_v17  ;;  %1393 = vmatpush2.msra.mxu0 %v989_v21  ;;  %v852_v17 = vld [vmem:[#allocation11 + $0xcf8] sm:$0xff]  ;;  %v531_v21 = vld [vmem:[#allocation11 + $0x2f0] sm:$0xff] }
 0x229   :  { %1323 = vmatprep.subr.mxu1 %v660_v24  ;;  %1394 = vmatprep.subr.mxu0 %v980_v25  ;;  %v851_v24 = vld [vmem:[#allocation11 + $0xcf0] sm:$0xff]  ;;  %v522_v25 = vld [vmem:[#allocation11 + $0x2a8] sm:$0xff] }
 0x22a   :  { %1324 = vmatpush2.msra.mxu1 %v659_v26  ;;  %1395 = vmatpush2.msra.mxu0 %v979_v27  ;;  %v842_v26 = vld [vmem:[#allocation11 + $0xca8] sm:$0xff]  ;;  %v521_v27 = vld [vmem:[#allocation11 + $0x2a0] sm:$0xff] }
 0x22b   :  { %1325 = vmatprep.subr.mxu1 %v650_v28  ;;  %1396 = vmatprep.subr.mxu0 %v970_v29  ;;  %v841_v28 = vld [vmem:[#allocation11 + $0xca0] sm:$0xff]  ;;  %v512_v29 = vld [vmem:[#allocation11 + $0x258] sm:$0xff] }
 0x22c   :  { %1326 = vmatpush2.msra.mxu1 %v649_v30  ;;  %1397 = vmatpush2.msra.mxu0 %v969_v31  ;;  %v832_v30 = vld [vmem:[#allocation11 + $0xc58] sm:$0xff]  ;;  %v511_v31 = vld [vmem:[#allocation11 + $0x250] sm:$0xff] }
 0x22d   :  { %1327 = vmatprep.subr.mxu1 %v640_v32  ;;  %1398 = vmatprep.subr.mxu0 %v960_v33  ;;  %v831_v32 = vld [vmem:[#allocation11 + $0xc50] sm:$0xff]  ;;  %v502_v33 = vld [vmem:[#allocation11 + $0x208] sm:$0xff] }
 0x22e   :  { %1328 = vmatpush2.msra.mxu1 %v639_v34  ;;  %1399 = vmatpush2.msra.mxu0 %v959_v35  ;;  %v822_v34 = vld [vmem:[#allocation11 + $0xc08] sm:$0xff]  ;;  %v501_v35 = vld [vmem:[#allocation11 + $0x200] sm:$0xff] }
 0x22f   :  { %1329 = vmatprep.subr.mxu1 %v630_v40  ;;  %1400 = vmatprep.subr.mxu0 %v950_v41  ;;  %v821_v40 = vld [vmem:[#allocation11 + $0xc00] sm:$0xff]  ;;  %v492_v41 = vld [vmem:[#allocation11 + $0x1b8] sm:$0xff] }
 0x230   :  { %1330 = vmatpush2.msra.mxu1 %v629_v42  ;;  %1401 = vmatpush2.msra.mxu0 %v949_v43  ;;  %v812_v42 = vld [vmem:[#allocation11 + $0xbb8] sm:$0xff]  ;;  %v491_v43 = vld [vmem:[#allocation11 + $0x1b0] sm:$0xff] }
 0x231   :  { %1331 = vmatprep.subr.mxu1 %v620_v44  ;;  %1402 = vmatprep.subr.mxu0 %v940_v45  ;;  %v811_v44 = vld [vmem:[#allocation11 + $0xbb0] sm:$0xff]  ;;  %v482_v45 = vld [vmem:[#allocation11 + $0x168] sm:$0xff] }
 0x232   :  { %1332 = vmatpush2.msra.mxu1 %v619_v46  ;;  %1403 = vmatpush2.msra.mxu0 %v939_v47  ;;  %v802_v46 = vld [vmem:[#allocation11 + $0xb68] sm:$0xff]  ;;  %v481_v47 = vld [vmem:[#allocation11 + $0x160] sm:$0xff] }
 0x233   :  { %1333 = vmatprep.subr.mxu1 %v610_v48  ;;  %1404 = vmatprep.subr.mxu0 %v930_v49  ;;  %v801_v48 = vld [vmem:[#allocation11 + $0xb60] sm:$0xff]  ;;  %v472_v49 = vld [vmem:[#allocation11 + $0x118] sm:$0xff] }
 0x234   :  { %1334 = vmatpush2.msra.mxu1 %v609_v50  ;;  %1405 = vmatpush2.msra.mxu0 %v929_v51  ;;  %v792_v50 = vld [vmem:[#allocation11 + $0xb18] sm:$0xff]  ;;  %v471_v51 = vld [vmem:[#allocation11 + $0x110] sm:$0xff] }
 0x235   :  { %1335 = vmatprep.subr.mxu1 %v600_v52  ;;  %1406 = vmatprep.subr.mxu0 %v920_v53  ;;  %v791_v52 = vld [vmem:[#allocation11 + $0xb10] sm:$0xff]  ;;  %v462_v53 = vld [vmem:[#allocation11 + $0xc8] sm:$0xff] }
 0x236   :  { %1336 = vmatpush2.msra.mxu1 %v599_v54  ;;  %1407 = vmatpush2.msra.mxu0 %v919_v55  ;;  %v782_v54 = vld [vmem:[#allocation11 + $0xac8] sm:$0xff]  ;;  %v461_v55 = vld [vmem:[#allocation11 + $0xc0] sm:$0xff] }
 0x237   :  { %1338 = vmatmul.mubr.f32.vlgmr.msra.gmra.mxu1 %v2293_v38  ;;  %1409 = vmatmul.mubr.f32.vlgmr.msra.gmra.mxu0 %v2295_v39 }
 0x238   :  { %1415 = vmatprep.subr.mxu1 %v592_v56  ;;  %1486 = vmatprep.subr.mxu0 %v912_v57  ;;  %v781_v56 = vld [vmem:[#allocation11 + $0xac0] sm:$0xff]  ;;  %v452_v57 = vld [vmem:[#allocation11 + $0x78] sm:$0xff] }
 0x239   :  { %1416 = vmatpush1.msra.mxu1 %v591_v58  ;;  %1479 = vmatprep.mubr.f32.mxu1 %v2289_v36  ;;  %v772_v58 = vld [vmem:[#allocation11 + $0xa78] sm:$0xff] }
 0x23a   :  { %1487 = vmatpush1.msra.mxu0 %v911_v59  ;;  %1550 = vmatprep.mubr.f32.mxu0 %v2291_v37  ;;  %v451_v59 = vld [vmem:[#allocation11 + $0x70] sm:$0xff] }
 0x23b   :  { %1417 = vmatprep.subr.mxu1 %v582_v60  ;;  %1488 = vmatprep.subr.mxu0 %v902_v61  ;;  %v771_v60 = vld [vmem:[#allocation11 + $0xa70] sm:$0xff]  ;;  %v442_v61 = vld [vmem:[#allocation11 + $0x28] sm:$0xff] }
 0x23c   :  { %1418 = vmatpush1.msra.mxu1 %v581_v62  ;;  %1489 = vmatpush1.msra.mxu0 %v901_v63  ;;  %v762_v62 = vld [vmem:[#allocation11 + $0xa28] sm:$0xff]  ;;  %v441_v63 = vld [vmem:[#allocation11 + $0x20] sm:$0xff] }
 0x23d   :  { %1419 = vmatprep.subr.mxu1 %v572_v1  ;;  %1490 = vmatprep.subr.mxu0 %v892_v2  ;;  %v761_v1 = vld [vmem:[#allocation11 + $0xa20] sm:$0xff]  ;;  %v752_v2 = vld [vmem:[#allocation11 + $0x9d8] sm:$0xff] }
 0x23e   :  { %1420 = vmatpush1.msra.mxu1 %v571_v0  ;;  %1491 = vmatpush1.msra.mxu0 %v891_v3  ;;  %v1072_v0 = vld [vmem:[#allocation11 + $0x13d8] sm:$0xff]  ;;  %v751_v3 = vld [vmem:[#allocation11 + $0x9d0] sm:$0xff] }
 0x23f   :  { %1421 = vmatprep.subr.mxu1 %v562_v4  ;;  %1492 = vmatprep.subr.mxu0 %v882_v5  ;;  %v1071_v4 = vld [vmem:[#allocation11 + $0x13d0] sm:$0xff]  ;;  %v742_v5 = vld [vmem:[#allocation11 + $0x988] sm:$0xff] }
 0x240   :  { %1422 = vmatpush1.msra.mxu1 %v561_v6  ;;  %1493 = vmatpush1.msra.mxu0 %v881_v7  ;;  %v1062_v6 = vld [vmem:[#allocation11 + $0x1388] sm:$0xff]  ;;  %v741_v7 = vld [vmem:[#allocation11 + $0x980] sm:$0xff] }
 0x241   :  { %1423 = vmatprep.subr.mxu1 %v552_v8  ;;  %1494 = vmatprep.subr.mxu0 %v872_v9  ;;  %v1061_v8 = vld [vmem:[#allocation11 + $0x1380] sm:$0xff]  ;;  %v732_v9 = vld [vmem:[#allocation11 + $0x938] sm:$0xff] }
 0x242   :  { %1424 = vmatpush1.msra.mxu1 %v551_v10  ;;  %1495 = vmatpush1.msra.mxu0 %v871_v11  ;;  %v1052_v10 = vld [vmem:[#allocation11 + $0x1338] sm:$0xff]  ;;  %v731_v11 = vld [vmem:[#allocation11 + $0x930] sm:$0xff] }
 0x243   :  { %1425 = vmatprep.subr.mxu1 %v542_v12  ;;  %1496 = vmatprep.subr.mxu0 %v862_v13  ;;  %v1051_v12 = vld [vmem:[#allocation11 + $0x1330] sm:$0xff]  ;;  %v722_v13 = vld [vmem:[#allocation11 + $0x8e8] sm:$0xff] }
 0x244   :  { %1426 = vmatpush1.msra.mxu1 %v541_v14  ;;  %1497 = vmatpush1.msra.mxu0 %v861_v15  ;;  %v1042_v14 = vld [vmem:[#allocation11 + $0x12e8] sm:$0xff]  ;;  %v721_v15 = vld [vmem:[#allocation11 + $0x8e0] sm:$0xff] }
 0x245   :  { %1427 = vmatprep.subr.mxu1 %v532_v16  ;;  %1498 = vmatprep.subr.mxu0 %v852_v17  ;;  %v1041_v16 = vld [vmem:[#allocation11 + $0x12e0] sm:$0xff]  ;;  %v712_v17 = vld [vmem:[#allocation11 + $0x898] sm:$0xff] }
 0x246   :  { %1428 = vmatpush1.msra.mxu1 %v531_v21  ;;  %1499 = vmatpush1.msra.mxu0 %v851_v24  ;;  %v1032_v21 = vld [vmem:[#allocation11 + $0x1298] sm:$0xff]  ;;  %v711_v24 = vld [vmem:[#allocation11 + $0x890] sm:$0xff] }
 0x247   :  { %1429 = vmatprep.subr.mxu1 %v522_v25  ;;  %1500 = vmatprep.subr.mxu0 %v842_v26  ;;  %v1031_v25 = vld [vmem:[#allocation11 + $0x1290] sm:$0xff]  ;;  %v702_v26 = vld [vmem:[#allocation11 + $0x848] sm:$0xff] }
 0x248   :  { %1430 = vmatpush1.msra.mxu1 %v521_v27  ;;  %1501 = vmatpush1.msra.mxu0 %v841_v28  ;;  %v1022_v27 = vld [vmem:[#allocation11 + $0x1248] sm:$0xff]  ;;  %v701_v28 = vld [vmem:[#allocation11 + $0x840] sm:$0xff] }
 0x249   :  { %1431 = vmatprep.subr.mxu1 %v512_v29  ;;  %1502 = vmatprep.subr.mxu0 %v832_v30  ;;  %v1021_v29 = vld [vmem:[#allocation11 + $0x1240] sm:$0xff]  ;;  %v692_v30 = vld [vmem:[#allocation11 + $0x7f8] sm:$0xff] }
 0x24a   :  { %1432 = vmatpush1.msra.mxu1 %v511_v31  ;;  %1503 = vmatpush1.msra.mxu0 %v831_v32  ;;  %v1012_v31 = vld [vmem:[#allocation11 + $0x11f8] sm:$0xff]  ;;  %v691_v32 = vld [vmem:[#allocation11 + $0x7f0] sm:$0xff] }
 0x24b   :  { %1433 = vmatprep.subr.mxu1 %v502_v33  ;;  %1504 = vmatprep.subr.mxu0 %v822_v34  ;;  %v1011_v33 = vld [vmem:[#allocation11 + $0x11f0] sm:$0xff]  ;;  %v682_v34 = vld [vmem:[#allocation11 + $0x7a8] sm:$0xff] }
 0x24c   :  { %1434 = vmatpush1.msra.mxu1 %v501_v35  ;;  %1505 = vmatpush1.msra.mxu0 %v821_v40  ;;  %v1002_v35 = vld [vmem:[#allocation11 + $0x11a8] sm:$0xff]  ;;  %v681_v40 = vld [vmem:[#allocation11 + $0x7a0] sm:$0xff] }
 0x24d   :  { %1435 = vmatprep.subr.mxu1 %v492_v41  ;;  %1506 = vmatprep.subr.mxu0 %v812_v42  ;;  %v1001_v41 = vld [vmem:[#allocation11 + $0x11a0] sm:$0xff]  ;;  %v672_v42 = vld [vmem:[#allocation11 + $0x758] sm:$0xff] }
 0x24e   :  { %1436 = vmatpush1.msra.mxu1 %v491_v43  ;;  %1507 = vmatpush1.msra.mxu0 %v811_v44  ;;  %v992_v43 = vld [vmem:[#allocation11 + $0x1158] sm:$0xff]  ;;  %v671_v44 = vld [vmem:[#allocation11 + $0x750] sm:$0xff] }
 0x24f   :  { %1437 = vmatprep.subr.mxu1 %v482_v45  ;;  %1508 = vmatprep.subr.mxu0 %v802_v46  ;;  %v991_v45 = vld [vmem:[#allocation11 + $0x1150] sm:$0xff]  ;;  %v662_v46 = vld [vmem:[#allocation11 + $0x708] sm:$0xff] }
 0x250   :  { %1438 = vmatpush1.msra.mxu1 %v481_v47  ;;  %1509 = vmatpush1.msra.mxu0 %v801_v48  ;;  %v982_v47 = vld [vmem:[#allocation11 + $0x1108] sm:$0xff]  ;;  %v661_v48 = vld [vmem:[#allocation11 + $0x700] sm:$0xff] }
 0x251   :  { %1439 = vmatprep.subr.mxu1 %v472_v49  ;;  %1510 = vmatprep.subr.mxu0 %v792_v50  ;;  %v981_v49 = vld [vmem:[#allocation11 + $0x1100] sm:$0xff]  ;;  %v652_v50 = vld [vmem:[#allocation11 + $0x6b8] sm:$0xff] }
 0x252   :  { %1440 = vmatpush1.msra.mxu1 %v471_v51  ;;  %1511 = vmatpush1.msra.mxu0 %v791_v52  ;;  %v972_v51 = vld [vmem:[#allocation11 + $0x10b8] sm:$0xff]  ;;  %v651_v52 = vld [vmem:[#allocation11 + $0x6b0] sm:$0xff] }
 0x253   :  { %1441 = vmatprep.subr.mxu1 %v462_v53  ;;  %1512 = vmatprep.subr.mxu0 %v782_v54  ;;  %v971_v53 = vld [vmem:[#allocation11 + $0x10b0] sm:$0xff]  ;;  %v642_v54 = vld [vmem:[#allocation11 + $0x668] sm:$0xff] }
 0x254   :  { %1442 = vmatpush1.msra.mxu1 %v461_v55  ;;  %1513 = vmatpush1.msra.mxu0 %v781_v56  ;;  %v962_v55 = vld [vmem:[#allocation11 + $0x1068] sm:$0xff]  ;;  %v641_v56 = vld [vmem:[#allocation11 + $0x660] sm:$0xff] }
 0x255   :  { %1443 = vmatprep.subr.mxu1 %v452_v57  ;;  %1514 = vmatprep.subr.mxu0 %v772_v58  ;;  %v961_v57 = vld [vmem:[#allocation11 + $0x1060] sm:$0xff]  ;;  %v632_v58 = vld [vmem:[#allocation11 + $0x618] sm:$0xff] }
 0x256   :  { %1444 = vmatpush1.msra.mxu1 %v451_v59  ;;  %1515 = vmatpush1.msra.mxu0 %v771_v60  ;;  %v952_v59 = vld [vmem:[#allocation11 + $0x1018] sm:$0xff]  ;;  %v631_v60 = vld [vmem:[#allocation11 + $0x610] sm:$0xff] }
 0x257   :  { %1445 = vmatprep.subr.mxu1 %v442_v61  ;;  %1516 = vmatprep.subr.mxu0 %v762_v62  ;;  %v951_v61 = vld [vmem:[#allocation11 + $0x1010] sm:$0xff]  ;;  %v622_v62 = vld [vmem:[#allocation11 + $0x5c8] sm:$0xff] }
 0x258   :  { %1446 = vmatpush1.msra.mxu1 %v441_v63  ;;  %1517 = vmatpush1.msra.mxu0 %v761_v1  ;;  %v942_v63 = vld [vmem:[#allocation11 + $0xfc8] sm:$0xff]  ;;  %v621_v1 = vld [vmem:[#allocation11 + $0x5c0] sm:$0xff] }
 0x259   :  { %1447 = vmatprep.subr.mxu1 %v752_v2  ;;  %1518 = vmatprep.subr.mxu0 %v1072_v0  ;;  %v941_v2 = vld [vmem:[#allocation11 + $0xfc0] sm:$0xff]  ;;  %v612_v0 = vld [vmem:[#allocation11 + $0x578] sm:$0xff] }
 0x25a   :  { %1448 = vmatpush2.msra.mxu1 %v751_v3  ;;  %1519 = vmatpush2.msra.mxu0 %v1071_v4  ;;  %v932_v3 = vld [vmem:[#allocation11 + $0xf78] sm:$0xff]  ;;  %v611_v4 = vld [vmem:[#allocation11 + $0x570] sm:$0xff] }
 0x25b   :  { %1449 = vmatprep.subr.mxu1 %v742_v5  ;;  %1520 = vmatprep.subr.mxu0 %v1062_v6  ;;  %v931_v5 = vld [vmem:[#allocation11 + $0xf70] sm:$0xff]  ;;  %v602_v6 = vld [vmem:[#allocation11 + $0x528] sm:$0xff] }
 0x25c   :  { %1450 = vmatpush2.msra.mxu1 %v741_v7  ;;  %1521 = vmatpush2.msra.mxu0 %v1061_v8  ;;  %v922_v7 = vld [vmem:[#allocation11 + $0xf28] sm:$0xff]  ;;  %v601_v8 = vld [vmem:[#allocation11 + $0x520] sm:$0xff] }
 0x25d   :  { %1451 = vmatprep.subr.mxu1 %v732_v9  ;;  %1522 = vmatprep.subr.mxu0 %v1052_v10  ;;  %v921_v9 = vld [vmem:[#allocation11 + $0xf20] sm:$0xff]  ;;  %v594_v10 = vld [vmem:[#allocation11 + $0x4e8] sm:$0xff] }
 0x25e   :  { %1452 = vmatpush2.msra.mxu1 %v731_v11  ;;  %1523 = vmatpush2.msra.mxu0 %v1051_v12  ;;  %v914_v11 = vld [vmem:[#allocation11 + $0xee8] sm:$0xff]  ;;  %v593_v12 = vld [vmem:[#allocation11 + $0x4e0] sm:$0xff] }
 0x25f   :  { %1453 = vmatprep.subr.mxu1 %v722_v13  ;;  %1524 = vmatprep.subr.mxu0 %v1042_v14  ;;  %v913_v13 = vld [vmem:[#allocation11 + $0xee0] sm:$0xff]  ;;  %v584_v14 = vld [vmem:[#allocation11 + $0x498] sm:$0xff] }
 0x260   :  { %1454 = vmatpush2.msra.mxu1 %v721_v15  ;;  %1525 = vmatpush2.msra.mxu0 %v1041_v16  ;;  %v904_v15 = vld [vmem:[#allocation11 + $0xe98] sm:$0xff]  ;;  %v583_v16 = vld [vmem:[#allocation11 + $0x490] sm:$0xff] }
 0x261   :  { %1455 = vmatprep.subr.mxu1 %v712_v17  ;;  %1526 = vmatprep.subr.mxu0 %v1032_v21  ;;  %v903_v17 = vld [vmem:[#allocation11 + $0xe90] sm:$0xff]  ;;  %v574_v21 = vld [vmem:[#allocation11 + $0x448] sm:$0xff] }
 0x262   :  { %1456 = vmatpush2.msra.mxu1 %v711_v24  ;;  %1527 = vmatpush2.msra.mxu0 %v1031_v25  ;;  %v894_v24 = vld [vmem:[#allocation11 + $0xe48] sm:$0xff]  ;;  %v573_v25 = vld [vmem:[#allocation11 + $0x440] sm:$0xff] }
 0x263   :  { %1457 = vmatprep.subr.mxu1 %v702_v26  ;;  %1528 = vmatprep.subr.mxu0 %v1022_v27  ;;  %v893_v26 = vld [vmem:[#allocation11 + $0xe40] sm:$0xff]  ;;  %v564_v27 = vld [vmem:[#allocation11 + $0x3f8] sm:$0xff] }
 0x264   :  { %1458 = vmatpush2.msra.mxu1 %v701_v28  ;;  %1529 = vmatpush2.msra.mxu0 %v1021_v29  ;;  %v884_v28 = vld [vmem:[#allocation11 + $0xdf8] sm:$0xff]  ;;  %v563_v29 = vld [vmem:[#allocation11 + $0x3f0] sm:$0xff] }
 0x265   :  { %1459 = vmatprep.subr.mxu1 %v692_v30  ;;  %1530 = vmatprep.subr.mxu0 %v1012_v31  ;;  %v883_v30 = vld [vmem:[#allocation11 + $0xdf0] sm:$0xff]  ;;  %v554_v31 = vld [vmem:[#allocation11 + $0x3a8] sm:$0xff] }
 0x266   :  { %1460 = vmatpush2.msra.mxu1 %v691_v32  ;;  %1531 = vmatpush2.msra.mxu0 %v1011_v33  ;;  %v874_v32 = vld [vmem:[#allocation11 + $0xda8] sm:$0xff]  ;;  %v553_v33 = vld [vmem:[#allocation11 + $0x3a0] sm:$0xff] }
 0x267   :  { %1461 = vmatprep.subr.mxu1 %v682_v34  ;;  %1532 = vmatprep.subr.mxu0 %v1002_v35  ;;  %v873_v34 = vld [vmem:[#allocation11 + $0xda0] sm:$0xff]  ;;  %v544_v35 = vld [vmem:[#allocation11 + $0x358] sm:$0xff] }
 0x268   :  { %1462 = vmatpush2.msra.mxu1 %v681_v40  ;;  %1533 = vmatpush2.msra.mxu0 %v1001_v41  ;;  %v864_v40 = vld [vmem:[#allocation11 + $0xd58] sm:$0xff]  ;;  %v543_v41 = vld [vmem:[#allocation11 + $0x350] sm:$0xff] }
 0x269   :  { %1463 = vmatprep.subr.mxu1 %v672_v42  ;;  %1534 = vmatprep.subr.mxu0 %v992_v43  ;;  %v863_v42 = vld [vmem:[#allocation11 + $0xd50] sm:$0xff]  ;;  %v534_v43 = vld [vmem:[#allocation11 + $0x308] sm:$0xff] }
 0x26a   :  { %1464 = vmatpush2.msra.mxu1 %v671_v44  ;;  %1535 = vmatpush2.msra.mxu0 %v991_v45  ;;  %v854_v44 = vld [vmem:[#allocation11 + $0xd08] sm:$0xff]  ;;  %v533_v45 = vld [vmem:[#allocation11 + $0x300] sm:$0xff] }
 0x26b   :  { %1465 = vmatprep.subr.mxu1 %v662_v46  ;;  %1536 = vmatprep.subr.mxu0 %v982_v47  ;;  %v853_v46 = vld [vmem:[#allocation11 + $0xd00] sm:$0xff]  ;;  %v524_v47 = vld [vmem:[#allocation11 + $0x2b8] sm:$0xff] }
 0x26c   :  { %1466 = vmatpush2.msra.mxu1 %v661_v48  ;;  %1537 = vmatpush2.msra.mxu0 %v981_v49  ;;  %v844_v48 = vld [vmem:[#allocation11 + $0xcb8] sm:$0xff]  ;;  %v523_v49 = vld [vmem:[#allocation11 + $0x2b0] sm:$0xff] }
 0x26d   :  { %1467 = vmatprep.subr.mxu1 %v652_v50  ;;  %1538 = vmatprep.subr.mxu0 %v972_v51  ;;  %v843_v50 = vld [vmem:[#allocation11 + $0xcb0] sm:$0xff]  ;;  %v514_v51 = vld [vmem:[#allocation11 + $0x268] sm:$0xff] }
 0x26e   :  { %1468 = vmatpush2.msra.mxu1 %v651_v52  ;;  %1539 = vmatpush2.msra.mxu0 %v971_v53  ;;  %v834_v52 = vld [vmem:[#allocation11 + $0xc68] sm:$0xff]  ;;  %v513_v53 = vld [vmem:[#allocation11 + $0x260] sm:$0xff] }
 0x26f   :  { %1469 = vmatprep.subr.mxu1 %v642_v54  ;;  %1540 = vmatprep.subr.mxu0 %v962_v55  ;;  %v833_v54 = vld [vmem:[#allocation11 + $0xc60] sm:$0xff]  ;;  %v504_v55 = vld [vmem:[#allocation11 + $0x218] sm:$0xff] }
 0x270   :  { %1470 = vmatpush2.msra.mxu1 %v641_v56  ;;  %1541 = vmatpush2.msra.mxu0 %v961_v57  ;;  %v824_v56 = vld [vmem:[#allocation11 + $0xc18] sm:$0xff]  ;;  %v503_v57 = vld [vmem:[#allocation11 + $0x210] sm:$0xff] }
 0x271   :  { %1471 = vmatprep.subr.mxu1 %v632_v58  ;;  %1542 = vmatprep.subr.mxu0 %v952_v59  ;;  %v823_v58 = vld [vmem:[#allocation11 + $0xc10] sm:$0xff]  ;;  %v494_v59 = vld [vmem:[#allocation11 + $0x1c8] sm:$0xff] }
 0x272   :  { %1472 = vmatpush2.msra.mxu1 %v631_v60  ;;  %1543 = vmatpush2.msra.mxu0 %v951_v61  ;;  %v814_v60 = vld [vmem:[#allocation11 + $0xbc8] sm:$0xff]  ;;  %v493_v61 = vld [vmem:[#allocation11 + $0x1c0] sm:$0xff] }
 0x273   :  { %1473 = vmatprep.subr.mxu1 %v622_v62  ;;  %1544 = vmatprep.subr.mxu0 %v942_v63  ;;  %v813_v62 = vld [vmem:[#allocation11 + $0xbc0] sm:$0xff]  ;;  %v484_v63 = vld [vmem:[#allocation11 + $0x178] sm:$0xff] }
 0x274   :  { %1474 = vmatpush2.msra.mxu1 %v621_v1  ;;  %1545 = vmatpush2.msra.mxu0 %v941_v2  ;;  %v804_v1 = vld [vmem:[#allocation11 + $0xb78] sm:$0xff]  ;;  %v483_v2 = vld [vmem:[#allocation11 + $0x170] sm:$0xff] }
 0x275   :  { %1475 = vmatprep.subr.mxu1 %v612_v0  ;;  %1546 = vmatprep.subr.mxu0 %v932_v3  ;;  %v803_v0 = vld [vmem:[#allocation11 + $0xb70] sm:$0xff]  ;;  %v474_v3 = vld [vmem:[#allocation11 + $0x128] sm:$0xff] }
 0x276   :  { %1476 = vmatpush2.msra.mxu1 %v611_v4  ;;  %1547 = vmatpush2.msra.mxu0 %v931_v5  ;;  %v794_v4 = vld [vmem:[#allocation11 + $0xb28] sm:$0xff]  ;;  %v473_v5 = vld [vmem:[#allocation11 + $0x120] sm:$0xff] }
 0x277   :  { %1477 = vmatprep.subr.mxu1 %v602_v6  ;;  %1548 = vmatprep.subr.mxu0 %v922_v7  ;;  %v793_v6 = vld [vmem:[#allocation11 + $0xb20] sm:$0xff]  ;;  %v464_v7 = vld [vmem:[#allocation11 + $0xd8] sm:$0xff] }
 0x278   :  { %1478 = vmatpush2.msra.mxu1 %v601_v8  ;;  %1549 = vmatpush2.msra.mxu0 %v921_v9  ;;  %v784_v8 = vld [vmem:[#allocation11 + $0xad8] sm:$0xff]  ;;  %v463_v9 = vld [vmem:[#allocation11 + $0xd0] sm:$0xff] }
 0x279   :  { %1480 = vmatmul.mubr.f32.vlgmr.msra.gmra.mxu1 %v2293_v38  ;;  %1551 = vmatmul.mubr.f32.vlgmr.msra.gmra.mxu0 %v2295_v39 }
 0x27a   :  { %1557 = vmatprep.subr.mxu1 %v594_v10  ;;  %1628 = vmatprep.subr.mxu0 %v914_v11  ;;  %v783_v10 = vld [vmem:[#allocation11 + $0xad0] sm:$0xff]  ;;  %v454_v11 = vld [vmem:[#allocation11 + $0x88] sm:$0xff] }
 0x27b   :  { %1558 = vmatpush1.msra.mxu1 %v593_v12  ;;  %1621 = vmatprep.mubr.f32.mxu1 %v2289_v36  ;;  %v774_v12 = vld [vmem:[#allocation11 + $0xa88] sm:$0xff] }
 0x27c   :  { %1629 = vmatpush1.msra.mxu0 %v913_v13  ;;  %1692 = vmatprep.mubr.f32.mxu0 %v2291_v37  ;;  %v453_v13 = vld [vmem:[#allocation11 + $0x80] sm:$0xff] }
 0x27d   :  { %1559 = vmatprep.subr.mxu1 %v584_v14  ;;  %1630 = vmatprep.subr.mxu0 %v904_v15  ;;  %v773_v14 = vld [vmem:[#allocation11 + $0xa80] sm:$0xff]  ;;  %v444_v15 = vld [vmem:[#allocation11 + $0x38] sm:$0xff] }
 0x27e   :  { %1560 = vmatpush1.msra.mxu1 %v583_v16  ;;  %1631 = vmatpush1.msra.mxu0 %v903_v17  ;;  %v764_v16 = vld [vmem:[#allocation11 + $0xa38] sm:$0xff]  ;;  %v443_v17 = vld [vmem:[#allocation11 + $0x30] sm:$0xff] }
 0x27f   :  { %1561 = vmatprep.subr.mxu1 %v574_v21  ;;  %1632 = vmatprep.subr.mxu0 %v894_v24  ;;  %v763_v21 = vld [vmem:[#allocation11 + $0xa30] sm:$0xff]  ;;  %v754_v24 = vld [vmem:[#allocation11 + $0x9e8] sm:$0xff] }
 0x280   :  { %1562 = vmatpush1.msra.mxu1 %v573_v25  ;;  %1633 = vmatpush1.msra.mxu0 %v893_v26  ;;  %v1074_v25 = vld [vmem:[#allocation11 + $0x13e8] sm:$0xff]  ;;  %v753_v26 = vld [vmem:[#allocation11 + $0x9e0] sm:$0xff] }
 0x281   :  { %1563 = vmatprep.subr.mxu1 %v564_v27  ;;  %1634 = vmatprep.subr.mxu0 %v884_v28  ;;  %v1073_v27 = vld [vmem:[#allocation11 + $0x13e0] sm:$0xff]  ;;  %v744_v28 = vld [vmem:[#allocation11 + $0x998] sm:$0xff] }
 0x282   :  { %1564 = vmatpush1.msra.mxu1 %v563_v29  ;;  %1635 = vmatpush1.msra.mxu0 %v883_v30  ;;  %v1064_v29 = vld [vmem:[#allocation11 + $0x1398] sm:$0xff]  ;;  %v743_v30 = vld [vmem:[#allocation11 + $0x990] sm:$0xff] }
 0x283   :  { %1565 = vmatprep.subr.mxu1 %v554_v31  ;;  %1636 = vmatprep.subr.mxu0 %v874_v32  ;;  %v1063_v31 = vld [vmem:[#allocation11 + $0x1390] sm:$0xff]  ;;  %v734_v32 = vld [vmem:[#allocation11 + $0x948] sm:$0xff] }
 0x284   :  { %1566 = vmatpush1.msra.mxu1 %v553_v33  ;;  %1637 = vmatpush1.msra.mxu0 %v873_v34  ;;  %v1054_v33 = vld [vmem:[#allocation11 + $0x1348] sm:$0xff]  ;;  %v733_v34 = vld [vmem:[#allocation11 + $0x940] sm:$0xff] }
 0x285   :  { %1567 = vmatprep.subr.mxu1 %v544_v35  ;;  %1638 = vmatprep.subr.mxu0 %v864_v40  ;;  %v1053_v35 = vld [vmem:[#allocation11 + $0x1340] sm:$0xff]  ;;  %v724_v40 = vld [vmem:[#allocation11 + $0x8f8] sm:$0xff] }
 0x286   :  { %1568 = vmatpush1.msra.mxu1 %v543_v41  ;;  %1639 = vmatpush1.msra.mxu0 %v863_v42  ;;  %v1044_v41 = vld [vmem:[#allocation11 + $0x12f8] sm:$0xff]  ;;  %v723_v42 = vld [vmem:[#allocation11 + $0x8f0] sm:$0xff] }
 0x287   :  { %1569 = vmatprep.subr.mxu1 %v534_v43  ;;  %1640 = vmatprep.subr.mxu0 %v854_v44  ;;  %v1043_v43 = vld [vmem:[#allocation11 + $0x12f0] sm:$0xff]  ;;  %v714_v44 = vld [vmem:[#allocation11 + $0x8a8] sm:$0xff] }
 0x288   :  { %1570 = vmatpush1.msra.mxu1 %v533_v45  ;;  %1641 = vmatpush1.msra.mxu0 %v853_v46  ;;  %v1034_v45 = vld [vmem:[#allocation11 + $0x12a8] sm:$0xff]  ;;  %v713_v46 = vld [vmem:[#allocation11 + $0x8a0] sm:$0xff] }
 0x289   :  { %1571 = vmatprep.subr.mxu1 %v524_v47  ;;  %1642 = vmatprep.subr.mxu0 %v844_v48  ;;  %v1033_v47 = vld [vmem:[#allocation11 + $0x12a0] sm:$0xff]  ;;  %v704_v48 = vld [vmem:[#allocation11 + $0x858] sm:$0xff] }
 0x28a   :  { %1572 = vmatpush1.msra.mxu1 %v523_v49  ;;  %1643 = vmatpush1.msra.mxu0 %v843_v50  ;;  %v1024_v49 = vld [vmem:[#allocation11 + $0x1258] sm:$0xff]  ;;  %v703_v50 = vld [vmem:[#allocation11 + $0x850] sm:$0xff] }
 0x28b   :  { %1573 = vmatprep.subr.mxu1 %v514_v51  ;;  %1644 = vmatprep.subr.mxu0 %v834_v52  ;;  %v1023_v51 = vld [vmem:[#allocation11 + $0x1250] sm:$0xff]  ;;  %v694_v52 = vld [vmem:[#allocation11 + $0x808] sm:$0xff] }
 0x28c   :  { %1574 = vmatpush1.msra.mxu1 %v513_v53  ;;  %1645 = vmatpush1.msra.mxu0 %v833_v54  ;;  %v1014_v53 = vld [vmem:[#allocation11 + $0x1208] sm:$0xff]  ;;  %v693_v54 = vld [vmem:[#allocation11 + $0x800] sm:$0xff] }
 0x28d   :  { %1575 = vmatprep.subr.mxu1 %v504_v55  ;;  %1646 = vmatprep.subr.mxu0 %v824_v56  ;;  %v1013_v55 = vld [vmem:[#allocation11 + $0x1200] sm:$0xff]  ;;  %v684_v56 = vld [vmem:[#allocation11 + $0x7b8] sm:$0xff] }
 0x28e   :  { %1576 = vmatpush1.msra.mxu1 %v503_v57  ;;  %1647 = vmatpush1.msra.mxu0 %v823_v58  ;;  %v1004_v57 = vld [vmem:[#allocation11 + $0x11b8] sm:$0xff]  ;;  %v683_v58 = vld [vmem:[#allocation11 + $0x7b0] sm:$0xff] }
 0x28f   :  { %1577 = vmatprep.subr.mxu1 %v494_v59  ;;  %1648 = vmatprep.subr.mxu0 %v814_v60  ;;  %v1003_v59 = vld [vmem:[#allocation11 + $0x11b0] sm:$0xff]  ;;  %v674_v60 = vld [vmem:[#allocation11 + $0x768] sm:$0xff] }
 0x290   :  { %1578 = vmatpush1.msra.mxu1 %v493_v61  ;;  %1649 = vmatpush1.msra.mxu0 %v813_v62  ;;  %v994_v61 = vld [vmem:[#allocation11 + $0x1168] sm:$0xff]  ;;  %v673_v62 = vld [vmem:[#allocation11 + $0x760] sm:$0xff] }
 0x291   :  { %1579 = vmatprep.subr.mxu1 %v484_v63  ;;  %1650 = vmatprep.subr.mxu0 %v804_v1  ;;  %v993_v63 = vld [vmem:[#allocation11 + $0x1160] sm:$0xff]  ;;  %v664_v1 = vld [vmem:[#allocation11 + $0x718] sm:$0xff] }
 0x292   :  { %1580 = vmatpush1.msra.mxu1 %v483_v2  ;;  %1651 = vmatpush1.msra.mxu0 %v803_v0  ;;  %v984_v2 = vld [vmem:[#allocation11 + $0x1118] sm:$0xff]  ;;  %v663_v0 = vld [vmem:[#allocation11 + $0x710] sm:$0xff] }
 0x293   :  { %1581 = vmatprep.subr.mxu1 %v474_v3  ;;  %1652 = vmatprep.subr.mxu0 %v794_v4  ;;  %v983_v3 = vld [vmem:[#allocation11 + $0x1110] sm:$0xff]  ;;  %v654_v4 = vld [vmem:[#allocation11 + $0x6c8] sm:$0xff] }
 0x294   :  { %1582 = vmatpush1.msra.mxu1 %v473_v5  ;;  %1653 = vmatpush1.msra.mxu0 %v793_v6  ;;  %v974_v5 = vld [vmem:[#allocation11 + $0x10c8] sm:$0xff]  ;;  %v653_v6 = vld [vmem:[#allocation11 + $0x6c0] sm:$0xff] }
 0x295   :  { %1583 = vmatprep.subr.mxu1 %v464_v7  ;;  %1654 = vmatprep.subr.mxu0 %v784_v8  ;;  %v973_v7 = vld [vmem:[#allocation11 + $0x10c0] sm:$0xff]  ;;  %v644_v8 = vld [vmem:[#allocation11 + $0x678] sm:$0xff] }
 0x296   :  { %1584 = vmatpush1.msra.mxu1 %v463_v9  ;;  %1655 = vmatpush1.msra.mxu0 %v783_v10  ;;  %v964_v9 = vld [vmem:[#allocation11 + $0x1078] sm:$0xff]  ;;  %v643_v10 = vld [vmem:[#allocation11 + $0x670] sm:$0xff] }
 0x297   :  { %1585 = vmatprep.subr.mxu1 %v454_v11  ;;  %1656 = vmatprep.subr.mxu0 %v774_v12  ;;  %v963_v11 = vld [vmem:[#allocation11 + $0x1070] sm:$0xff]  ;;  %v634_v12 = vld [vmem:[#allocation11 + $0x628] sm:$0xff] }
 0x298   :  { %1586 = vmatpush1.msra.mxu1 %v453_v13  ;;  %1657 = vmatpush1.msra.mxu0 %v773_v14  ;;  %v954_v13 = vld [vmem:[#allocation11 + $0x1028] sm:$0xff]  ;;  %v2311_v14 = vld [vmem:[#allocation13] sm:$0xff] }
 0x299   :  { %1587 = vmatprep.subr.mxu1 %v444_v15  ;;  %1658 = vmatprep.subr.mxu0 %v764_v16  ;;  %v633_v15 = vld [vmem:[#allocation11 + $0x620] sm:$0xff] }
 0x29a   :  { %1588 = vmatpush1.msra.mxu1 %v443_v17  ;;  %1659 = vmatpush1.msra.mxu0 %v763_v21  ;;  %v953_v16 = vld [vmem:[#allocation11 + $0x1020] sm:$0xff]  ;;  %v624_v17 = vld [vmem:[#allocation11 + $0x5d8] sm:$0xff] }
 0x29b   :  { %1589 = vmatprep.subr.mxu1 %v754_v24  ;;  %1660 = vmatprep.subr.mxu0 %v1074_v25  ;;  %v944_v21 = vld [vmem:[#allocation11 + $0xfd8] sm:$0xff]  ;;  %v623_v24 = vld [vmem:[#allocation11 + $0x5d0] sm:$0xff] }
 0x29c   :  { %1590 = vmatpush2.msra.mxu1 %v753_v26  ;;  %1661 = vmatpush2.msra.mxu0 %v1073_v27  ;;  %v943_v25 = vld [vmem:[#allocation11 + $0xfd0] sm:$0xff]  ;;  %v1084_v26 = vrot.slane %v2311_v14, %v2276_v19  ;;  %v614_v27 = vld [vmem:[#allocation11 + $0x588] sm:$0xff] }
 0x29d   :  { %1591 = vmatprep.subr.mxu1 %v744_v28  ;;  %1662 = vmatprep.subr.mxu0 %v1064_v29  ;;  %v934_v28 = vld [vmem:[#allocation11 + $0xf88] sm:$0xff]  ;;  %v613_v29 = vld [vmem:[#allocation11 + $0x580] sm:$0xff] }
 0x29e   :  { %1592 = vmatpush2.msra.mxu1 %v743_v30  ;;  %1663 = vmatpush2.msra.mxu0 %v1063_v31  ;;  %v933_v30 = vld [vmem:[#allocation11 + $0xf80] sm:$0xff]  ;;  %v1088_v31 = vrot.slane %v2311_v14, %v2280_v22 }
 0x29f   :  { %1593 = vmatprep.subr.mxu1 %v734_v32  ;;  %1664 = vmatprep.subr.mxu0 %v1054_v33  ;;  %v604_v32 = vld [vmem:[#allocation11 + $0x538] sm:$0xff] }
 0x2a0   :  { %1594 = vmatpush2.msra.mxu1 %v733_v34  ;;  %1665 = vmatpush2.msra.mxu0 %v1053_v35  ;;  %v924_v33 = vld [vmem:[#allocation11 + $0xf38] sm:$0xff] }
 0x2a1   :  { %1595 = vmatprep.subr.mxu1 %v724_v40  ;;  %1666 = vmatprep.subr.mxu0 %v1044_v41  ;;  %v603_v40 = vld [vmem:[#allocation11 + $0x530] sm:$0xff] }
 0x2a2   :  { %1596 = vmatpush2.msra.mxu1 %v723_v42  ;;  %1667 = vmatpush2.msra.mxu0 %v1043_v43  ;;  %v923_v41 = vld [vmem:[#allocation11 + $0xf30] sm:$0xff] }
 0x2a3   :  { %1597 = vmatprep.subr.mxu1 %v714_v44  ;;  %1668 = vmatprep.subr.mxu0 %v1034_v45  ;;  %v596_v44 = vld [vmem:[#allocation11 + $0x4f8] sm:$0xff] }
 0x2a4   :  { %1598 = vmatpush2.msra.mxu1 %v713_v46  ;;  %1669 = vmatpush2.msra.mxu0 %v1033_v47  ;;  %v916_v45 = vld [vmem:[#allocation11 + $0xef8] sm:$0xff] }
 0x2a5   :  { %1599 = vmatprep.subr.mxu1 %v704_v48  ;;  %1670 = vmatprep.subr.mxu0 %v1024_v49  ;;  %v595_v48 = vld [vmem:[#allocation11 + $0x4f0] sm:$0xff] }
 0x2a6   :  { %1600 = vmatpush2.msra.mxu1 %v703_v50  ;;  %1671 = vmatpush2.msra.mxu0 %v1023_v51  ;;  %v915_v51 = vld [vmem:[#allocation11 + $0xef0] sm:$0xff] }
 0x2a7   :  { %1601 = vmatprep.subr.mxu1 %v694_v52  ;;  %1672 = vmatprep.subr.mxu0 %v1014_v53  ;;  %v586_v53 = vld [vmem:[#allocation11 + $0x4a8] sm:$0xff] }
 0x2a8   :  { %1602 = vmatpush2.msra.mxu1 %v693_v54  ;;  %1673 = vmatpush2.msra.mxu0 %v1013_v55  ;;  %v906_v54 = vld [vmem:[#allocation11 + $0xea8] sm:$0xff] }
 0x2a9   :  { %1603 = vmatprep.subr.mxu1 %v684_v56  ;;  %1674 = vmatprep.subr.mxu0 %v1004_v57  ;;  %v585_v57 = vld [vmem:[#allocation11 + $0x4a0] sm:$0xff] }
 0x2aa   :  { %1604 = vmatpush2.msra.mxu1 %v683_v58  ;;  %1675 = vmatpush2.msra.mxu0 %v1003_v59  ;;  %v905_v58 = vld [vmem:[#allocation11 + $0xea0] sm:$0xff]  ;;  %v576_v59 = vld [vmem:[#allocation11 + $0x458] sm:$0xff] }
 0x2ab   :  { %1605 = vmatprep.subr.mxu1 %v674_v60  ;;  %1676 = vmatprep.subr.mxu0 %v994_v61  ;;  %v896_v60 = vld [vmem:[#allocation11 + $0xe58] sm:$0xff] }
 0x2ac   :  { %1606 = vmatpush2.msra.mxu1 %v673_v62  ;;  %1677 = vmatpush2.msra.mxu0 %v993_v63  ;;  %v575_v62 = vld [vmem:[#allocation11 + $0x450] sm:$0xff] }
 0x2ad   :  { %1607 = vmatprep.subr.mxu1 %v664_v1  ;;  %1678 = vmatprep.subr.mxu0 %v984_v2  ;;  %v895_v63 = vld [vmem:[#allocation11 + $0xe50] sm:$0xff]  ;;  %v566_v1 = vld [vmem:[#allocation11 + $0x408] sm:$0xff] }
 0x2ae   :  { %1608 = vmatpush2.msra.mxu1 %v663_v0  ;;  %1679 = vmatpush2.msra.mxu0 %v983_v3  ;;  %v886_v2 = vld [vmem:[#allocation11 + $0xe08] sm:$0xff]  ;;  %v885_v0 = vld [vmem:[#allocation11 + $0xe00] sm:$0xff]  ;;  %v876_v3 = vld [vmem:[#allocation11 + $0xdb8] sm:$0xff] }
 0x2af   :  { %1609 = vmatprep.subr.mxu1 %v654_v4  ;;  %1680 = vmatprep.subr.mxu0 %v974_v5  ;;  %v555_v4 = vld [vmem:[#allocation11 + $0x3b0] sm:$0xff] }
 0x2b0   :  { %1610 = vmatpush2.msra.mxu1 %v653_v6  ;;  %1681 = vmatpush2.msra.mxu0 %v973_v7  ;;  %v875_v5 = vld [vmem:[#allocation11 + $0xdb0] sm:$0xff]  ;;  %v546_v6 = vld [vmem:[#allocation11 + $0x368] sm:$0xff] }
 0x2b1   :  { %1611 = vmatprep.subr.mxu1 %v644_v8  ;;  %1682 = vmatprep.subr.mxu0 %v964_v9  ;;  %v866_v7 = vld [vmem:[#allocation11 + $0xd68] sm:$0xff]  ;;  %v545_v8 = vld [vmem:[#allocation11 + $0x360] sm:$0xff] }
 0x2b2   :  { %1612 = vmatpush2.msra.mxu1 %v643_v10  ;;  %1683 = vmatpush2.msra.mxu0 %v963_v11  ;;  %v865_v9 = vld [vmem:[#allocation11 + $0xd60] sm:$0xff]  ;;  %v536_v10 = vld [vmem:[#allocation11 + $0x318] sm:$0xff] }
 0x2b3   :  { %1613 = vmatprep.subr.mxu1 %v634_v12  ;;  %1684 = vmatprep.subr.mxu0 %v954_v13  ;;  %v856_v11 = vld [vmem:[#allocation11 + $0xd18] sm:$0xff]  ;;  %v535_v12 = vld [vmem:[#allocation11 + $0x310] sm:$0xff] }
 0x2b4   :  { %1614 = vmatpush2.msra.mxu1 %v633_v15  ;;  %1685 = vmatpush2.msra.mxu0 %v953_v16  ;;  %v855_v13 = vld [vmem:[#allocation11 + $0xd10] sm:$0xff]  ;;  %v526_v15 = vld [vmem:[#allocation11 + $0x2c8] sm:$0xff] }
 0x2b5   :  { %1615 = vmatprep.subr.mxu1 %v624_v17  ;;  %1686 = vmatprep.subr.mxu0 %v944_v21  ;;  %v846_v16 = vld [vmem:[#allocation11 + $0xcc8] sm:$0xff]  ;;  %v525_v17 = vld [vmem:[#allocation11 + $0x2c0] sm:$0xff] }
 0x2b6   :  { %1616 = vmatpush2.msra.mxu1 %v623_v24  ;;  %1687 = vmatpush2.msra.mxu0 %v943_v25  ;;  %v1197_v34 = vpop.f32.mrf.mxu1  ;;  %v1268_v35 = vpop.f32.mrf.mxu0  ;;  %v845_v21 = vld [vmem:[#allocation11 + $0xcc0] sm:$0xff]  ;;  %v516_v24 = vld [vmem:[#allocation11 + $0x278] sm:$0xff] }
 0x2b7   :  { %1617 = vmatprep.subr.mxu1 %v614_v27  ;;  %1688 = vmatprep.subr.mxu0 %v934_v28  ;;  %v1198_v42 = vadd.f32 %v1197_v34, %v1084_v26  ;;  %v836_v25 = vld [vmem:[#allocation11 + $0xc78] sm:$0xff]  ;;  %v515_v26 = vld [vmem:[#allocation11 + $0x270] sm:$0xff] }
 0x2b8   :  { %1618 = vmatpush2.msra.mxu1 %v613_v29  ;;  %1689 = vmatpush2.msra.mxu0 %v933_v30  ;;  %v1199_v43 = vpop.f32.mrf.mxu1  ;;  %v1270_v49 = vpop.f32.mrf.mxu0  ;;  %v835_v27 = vld [vmem:[#allocation11 + $0xc70] sm:$0xff]  ;;  %v506_v29 = vld [vmem:[#allocation11 + $0x228] sm:$0xff] }
 0x2b9   :  { %1619 = vmatprep.subr.mxu1 %v604_v32  ;;  %1690 = vmatprep.subr.mxu0 %v924_v33  ;;  %v1269_v46 = vadd.f32 %v1268_v35, %v1198_v42  ;;  %v1200_v47 = vadd.f32 %v1199_v43, %v1088_v31  ;;  %v826_v30 = vld [vmem:[#allocation11 + $0xc28] sm:$0xff]  ;;  %v505_v32 = vld [vmem:[#allocation11 + $0x220] sm:$0xff]  ;;  %v496_v35 = vld [vmem:[#allocation11 + $0x1d8] sm:$0xff] }
 0x2ba   :  { %1620 = vmatpush2.msra.mxu1 %v603_v40  ;;  %1691 = vmatpush2.msra.mxu0 %v923_v41  ;;  %v825_v33 = vld [vmem:[#allocation11 + $0xc20] sm:$0xff]  ;;  %v816_v40 = vld [vmem:[#allocation11 + $0xbd8] sm:$0xff]  ;;  %v495_v42 = vld [vmem:[#allocation11 + $0x1d0] sm:$0xff] }
 0x2bb   :  { %1622 = vmatmul.mubr.f32.vlgmr.msra.gmra.mxu1 %v2293_v38  ;;  %1693 = vmatmul.mubr.f32.vlgmr.msra.gmra.mxu0 %v2295_v39  ;;  %v1841_v50 = vsub.f32 0.0, %v1269_v46  ;;  %v1271_v52 = vadd.f32 %v1270_v49, %v1200_v47  ;;  %v815_v43 = vld [vmem:[#allocation11 + $0xbd0] sm:$0xff]  ;;  %v485_v46 = vld [vmem:[#allocation11 + $0x180] sm:$0xff]  ;;  %v796_v49 = vld [vmem:[#allocation11 + $0xb38] sm:$0xff] }
 0x2bc   :  { %1699 = vmatprep.subr.mxu1 %v596_v44  ;;  %1770 = vmatprep.subr.mxu0 %v916_v45  ;;  %v486_v44 = vld [vmem:[#allocation11 + $0x188] sm:$0xff]  ;;  %v805_v47 = vld [vmem:[#allocation11 + $0xb80] sm:$0xff] }
 0x2bd   :  { %v1851_v55 = vmul.f32 1.442695, %v1841_v50  ;;  %1700 = vmatpush1.msra.mxu1 %v595_v48  ;;  %1763 = vmatprep.mubr.f32.mxu1 %v2289_v36  ;;  %v1842_v56 = vsub.f32 0.0, %v1271_v52  ;;  %v565_v36 = vld [vmem:[#allocation11 + $0x400] sm:$0xff]  ;;  %v806_v45 = vld [vmem:[#allocation11 + $0xb88] sm:$0xff]  ;;  %v476_v48 = vld [vmem:[#allocation11 + $0x138] sm:$0xff] }
 0x2be   :  { %1771 = vmatpush1.msra.mxu0 %v915_v51  ;;  %1834 = vmatprep.mubr.f32.mxu0 %v2291_v37  ;;  %v556_v37 = vld [vmem:[#allocation11 + $0x3b8] sm:$0xff]  ;;  %v475_v50 = vld [vmem:[#allocation11 + $0x130] sm:$0xff]  ;;  %v466_v52 = vld [vmem:[#allocation11 + $0xe8] sm:$0xff] }
 0x2bf   :  { %1975 = vpow2.f32 %v1851_v55  ;;  %1701 = vmatprep.subr.mxu1 %v586_v53  ;;  %1772 = vmatprep.subr.mxu0 %v906_v54  ;;  %v1853_v61 = vmul.f32 1.442695, %v1842_v56  ;;  %v795_v51 = vld [vmem:[#allocation11 + $0xb30] sm:$0xff]  ;;  %v786_v53 = vld [vmem:[#allocation11 + $0xae8] sm:$0xff]  ;;  %v465_v54 = vld [vmem:[#allocation11 + $0xe0] sm:$0xff] }
 0x2c0   :  { %1702 = vmatpush1.msra.mxu1 %v585_v57  ;;  %1773 = vmatpush1.msra.mxu0 %v905_v58  ;;  %v785_v55 = vld [vmem:[#allocation11 + $0xae0] sm:$0xff]  ;;  %v456_v56 = vld [vmem:[#allocation11 + $0x98] sm:$0xff]  ;;  %v455_v58 = vld [vmem:[#allocation11 + $0x90] sm:$0xff] }
 0x2c1   :  { %1977 = vpow2.f32 %v1853_v61  ;;  %1703 = vmatprep.subr.mxu1 %v576_v59  ;;  %1774 = vmatprep.subr.mxu0 %v896_v60  ;;  %v776_v57 = vld [vmem:[#allocation11 + $0xa98] sm:$0xff]  ;;  %v775_v59 = vld [vmem:[#allocation11 + $0xa90] sm:$0xff]  ;;  %v446_v60 = vld [vmem:[#allocation11 + $0x48] sm:$0xff] }
 0x2c2   :  { %1704 = vmatpush1.msra.mxu1 %v575_v62  ;;  %1775 = vmatpush1.msra.mxu0 %v895_v63  ;;  %v766_v61 = vld [vmem:[#allocation11 + $0xa48] sm:$0xff]  ;;  %v445_v62 = vld [vmem:[#allocation11 + $0x40] sm:$0xff] }
 0x2c3   :  { %1705 = vmatprep.subr.mxu1 %v566_v1  ;;  %1776 = vmatprep.subr.mxu0 %v886_v2  ;;  %v765_v63 = vld [vmem:[#allocation11 + $0xa40] sm:$0xff]  ;;  %v756_v1 = vld [vmem:[#allocation11 + $0x9f8] sm:$0xff] }
 0x2c4   :  { %1706 = vmatpush1.msra.mxu1 %v565_v36  ;;  %1777 = vmatpush1.msra.mxu0 %v885_v0  ;;  %v1076_v2 = vld [vmem:[#allocation11 + $0x13f8] sm:$0xff]  ;;  %v755_v36 = vld [vmem:[#allocation11 + $0x9f0] sm:$0xff] }
 0x2c5   :  { %1707 = vmatprep.subr.mxu1 %v556_v37  ;;  %1778 = vmatprep.subr.mxu0 %v876_v3  ;;  %v1075_v0 = vld [vmem:[#allocation11 + $0x13f0] sm:$0xff]  ;;  %v746_v3 = vld [vmem:[#allocation11 + $0x9a8] sm:$0xff] }
 0x2c6   :  { %1708 = vmatpush1.msra.mxu1 %v555_v4  ;;  %1779 = vmatpush1.msra.mxu0 %v875_v5  ;;  %v1066_v4 = vld [vmem:[#allocation11 + $0x13a8] sm:$0xff]  ;;  %v745_v5 = vld [vmem:[#allocation11 + $0x9a0] sm:$0xff] }
 0x2c7   :  { %1709 = vmatprep.subr.mxu1 %v546_v6  ;;  %1780 = vmatprep.subr.mxu0 %v866_v7  ;;  %v1065_v6 = vld [vmem:[#allocation11 + $0x13a0] sm:$0xff] }
 0x2c8   :  { %1710 = vmatpush1.msra.mxu1 %v545_v8  ;;  %1781 = vmatpush1.msra.mxu0 %v865_v9  ;;  %v736_v8 = vld [vmem:[#allocation11 + $0x958] sm:$0xff] }
 0x2c9   :  { %1711 = vmatprep.subr.mxu1 %v536_v10  ;;  %1782 = vmatprep.subr.mxu0 %v856_v11  ;;  %v1056_v9 = vld [vmem:[#allocation11 + $0x1358] sm:$0xff]  ;;  %v735_v10 = vld [vmem:[#allocation11 + $0x950] sm:$0xff] }
 0x2ca   :  { %1712 = vmatpush1.msra.mxu1 %v535_v12  ;;  %1783 = vmatpush1.msra.mxu0 %v855_v13  ;;  %v1055_v11 = vld [vmem:[#allocation11 + $0x1350] sm:$0xff]  ;;  %v726_v12 = vld [vmem:[#allocation11 + $0x908] sm:$0xff] }
 0x2cb   :  { %1713 = vmatprep.subr.mxu1 %v526_v15  ;;  %1784 = vmatprep.subr.mxu0 %v846_v16  ;;  %v1046_v13 = vld [vmem:[#allocation11 + $0x1308] sm:$0xff]  ;;  %v725_v15 = vld [vmem:[#allocation11 + $0x900] sm:$0xff] }
 0x2cc   :  { %v1976_v28 = vpop.eup %1975  ;;  %1714 = vmatpush1.msra.mxu1 %v525_v17  ;;  %1785 = vmatpush1.msra.mxu0 %v845_v21  ;;  %v1045_v16 = vld [vmem:[#allocation11 + $0x1300] sm:$0xff]  ;;  %v716_v17 = vld [vmem:[#allocation11 + $0x8b8] sm:$0xff] }
 0x2cd   :  { %v1871_v31 = vadd.f32 1.0, %v1976_v28  ;;  %1715 = vmatprep.subr.mxu1 %v516_v24  ;;  %1786 = vmatprep.subr.mxu0 %v836_v25  ;;  %v1036_v21 = vld [vmem:[#allocation11 + $0x12b8] sm:$0xff]  ;;  %v715_v24 = vld [vmem:[#allocation11 + $0x8b0] sm:$0xff]  ;;  %v705_v28 = vld [vmem:[#allocation11 + $0x860] sm:$0xff] }
 0x2ce   :  { %v1978_v34 = vpop.eup %1977  ;;  %1716 = vmatpush1.msra.mxu1 %v515_v26  ;;  %1787 = vmatpush1.msra.mxu0 %v835_v27  ;;  %v1035_v25 = vld [vmem:[#allocation11 + $0x12b0] sm:$0xff]  ;;  %v706_v26 = vld [vmem:[#allocation11 + $0x868] sm:$0xff] }
 0x2cf   :  { %1979 = vrcp.f32 %v1871_v31  ;;  %v1872_v41 = vadd.f32 1.0, %v1978_v34  ;;  %1717 = vmatprep.subr.mxu1 %v506_v29  ;;  %1788 = vmatprep.subr.mxu0 %v826_v30  ;;  %v1026_v27 = vld [vmem:[#allocation11 + $0x1268] sm:$0xff]  ;;  %v1025_v29 = vld [vmem:[#allocation11 + $0x1260] sm:$0xff]  ;;  %v696_v30 = vld [vmem:[#allocation11 + $0x818] sm:$0xff] }
 0x2d0   :  { %1718 = vmatpush1.msra.mxu1 %v505_v32  ;;  %1789 = vmatpush1.msra.mxu0 %v825_v33  ;;  %v1016_v31 = vld [vmem:[#allocation11 + $0x1218] sm:$0xff]  ;;  %v695_v32 = vld [vmem:[#allocation11 + $0x810] sm:$0xff]  ;;  %v686_v34 = vld [vmem:[#allocation11 + $0x7c8] sm:$0xff] }
 0x2d1   :  { %1981 = vrcp.f32 %v1872_v41  ;;  %1719 = vmatprep.subr.mxu1 %v496_v35  ;;  %1790 = vmatprep.subr.mxu0 %v816_v40  ;;  %v1015_v33 = vld [vmem:[#allocation11 + $0x1210] sm:$0xff]  ;;  %v1006_v35 = vld [vmem:[#allocation11 + $0x11c8] sm:$0xff]  ;;  %v685_v40 = vld [vmem:[#allocation11 + $0x7c0] sm:$0xff] }
 0x2d2   :  { %1720 = vmatpush1.msra.mxu1 %v495_v42  ;;  %1791 = vmatpush1.msra.mxu0 %v815_v43  ;;  %v1005_v41 = vld [vmem:[#allocation11 + $0x11c0] sm:$0xff]  ;;  %v676_v42 = vld [vmem:[#allocation11 + $0x778] sm:$0xff] }
 0x2d3   :  { %1721 = vmatprep.subr.mxu1 %v486_v44  ;;  %1792 = vmatprep.subr.mxu0 %v806_v45  ;;  %v996_v43 = vld [vmem:[#allocation11 + $0x1178] sm:$0xff]  ;;  %v675_v44 = vld [vmem:[#allocation11 + $0x770] sm:$0xff] }
 0x2d4   :  { %1722 = vmatpush1.msra.mxu1 %v485_v46  ;;  %1793 = vmatpush1.msra.mxu0 %v805_v47  ;;  %v995_v45 = vld [vmem:[#allocation11 + $0x1170] sm:$0xff]  ;;  %v666_v46 = vld [vmem:[#allocation11 + $0x728] sm:$0xff] }
 0x2d5   :  { %1723 = vmatprep.subr.mxu1 %v476_v48  ;;  %1794 = vmatprep.subr.mxu0 %v796_v49  ;;  %v986_v47 = vld [vmem:[#allocation11 + $0x1128] sm:$0xff]  ;;  %v665_v48 = vld [vmem:[#allocation11 + $0x720] sm:$0xff] }
 0x2d6   :  { %1724 = vmatpush1.msra.mxu1 %v475_v50  ;;  %1795 = vmatpush1.msra.mxu0 %v795_v51  ;;  %v985_v49 = vld [vmem:[#allocation11 + $0x1120] sm:$0xff]  ;;  %v656_v50 = vld [vmem:[#allocation11 + $0x6d8] sm:$0xff] }
 0x2d7   :  { %1725 = vmatprep.subr.mxu1 %v466_v52  ;;  %1796 = vmatprep.subr.mxu0 %v786_v53  ;;  %v976_v51 = vld [vmem:[#allocation11 + $0x10d8] sm:$0xff]  ;;  %v655_v52 = vld [vmem:[#allocation11 + $0x6d0] sm:$0xff] }
 0x2d8   :  { %1726 = vmatpush1.msra.mxu1 %v465_v54  ;;  %1797 = vmatpush1.msra.mxu0 %v785_v55  ;;  %v975_v53 = vld [vmem:[#allocation11 + $0x10d0] sm:$0xff]  ;;  %v646_v54 = vld [vmem:[#allocation11 + $0x688] sm:$0xff] }
 0x2d9   :  { %1727 = vmatprep.subr.mxu1 %v456_v56  ;;  %1798 = vmatprep.subr.mxu0 %v776_v57  ;;  %v966_v55 = vld [vmem:[#allocation11 + $0x1088] sm:$0xff]  ;;  %v645_v56 = vld [vmem:[#allocation11 + $0x680] sm:$0xff] }
 0x2da   :  { %1728 = vmatpush1.msra.mxu1 %v455_v58  ;;  %1799 = vmatpush1.msra.mxu0 %v775_v59  ;;  %v965_v57 = vld [vmem:[#allocation11 + $0x1080] sm:$0xff]  ;;  %v636_v58 = vld [vmem:[#allocation11 + $0x638] sm:$0xff] }
 0x2db   :  { %1729 = vmatprep.subr.mxu1 %v446_v60  ;;  %1800 = vmatprep.subr.mxu0 %v766_v61  ;;  %v956_v59 = vld [vmem:[#allocation11 + $0x1038] sm:$0xff]  ;;  %v635_v60 = vld [vmem:[#allocation11 + $0x630] sm:$0xff] }
 0x2dc   :  { %v1980_v37 = vpop.eup %1979  ;;  %1730 = vmatpush1.msra.mxu1 %v445_v62  ;;  %1801 = vmatpush1.msra.mxu0 %v765_v63  ;;  %v955_v61 = vld [vmem:[#allocation11 + $0x1030] sm:$0xff]  ;;  %v626_v62 = vld [vmem:[#allocation11 + $0x5e8] sm:$0xff] }
 0x2dd   :  { %1901 = vst [vmem:[#allocation14] sm:$0xff] %v1980_v37  ;;  %1731 = vmatprep.subr.mxu1 %v756_v1  ;;  %1802 = vmatprep.subr.mxu0 %v1076_v2  ;;  %v946_v63 = vld [vmem:[#allocation11 + $0xfe8] sm:$0xff]  ;;  %v1092_v1 = vrot.slane %v2311_v14, %v281_v20  ;;  %v625_v2 = vld [vmem:[#allocation11 + $0x5e0] sm:$0xff]  ;;  %v936_v37 = vld [vmem:[#allocation11 + $0xf98] sm:$0xff] }
 0x2de   :  { %v1982_v7 = vpop.eup %1981  ;;  %1732 = vmatpush2.msra.mxu1 %v755_v36  ;;  %1803 = vmatpush2.msra.mxu0 %v1075_v0  ;;  %v945_v36 = vld [vmem:[#allocation11 + $0xfe0] sm:$0xff]  ;;  %v616_v0 = vld [vmem:[#allocation11 + $0x598] sm:$0xff]  ;;  %v606_v20 = vld [vmem:[#allocation11 + $0x548] sm:$0xff] }
 0x2df   :  { %1902 = vst [vmem:[#allocation14 + $0x8] sm:$0xff] %v1982_v7  ;;  %1733 = vmatprep.subr.mxu1 %v746_v3  ;;  %1804 = vmatprep.subr.mxu0 %v1066_v4  ;;  %v1096_v3 = vrot.slane %v2311_v14, %v285_v23  ;;  %v615_v4 = vld [vmem:[#allocation11 + $0x590] sm:$0xff] }
 0x2e0   :  { %1734 = vmatpush2.msra.mxu1 %v745_v5  ;;  %1805 = vmatpush2.msra.mxu0 %v1065_v6  ;;  %v935_v5 = vld [vmem:[#allocation11 + $0xf90] sm:$0xff] }
 0x2e1   :  { %1735 = vmatprep.subr.mxu1 %v736_v8  ;;  %1806 = vmatprep.subr.mxu0 %v1056_v9  ;;  %v926_v8 = vld [vmem:[#allocation11 + $0xf48] sm:$0xff] }
 0x2e2   :  { %1736 = vmatpush2.msra.mxu1 %v735_v10  ;;  %1807 = vmatpush2.msra.mxu0 %v1055_v11  ;;  %v605_v10 = vld [vmem:[#allocation11 + $0x540] sm:$0xff] }
 0x2e3   :  { %1737 = vmatprep.subr.mxu1 %v726_v12  ;;  %1808 = vmatprep.subr.mxu0 %v1046_v13  ;;  %v925_v11 = vld [vmem:[#allocation11 + $0xf40] sm:$0xff] }
 0x2e4   :  { %1738 = vmatpush2.msra.mxu1 %v725_v15  ;;  %1809 = vmatpush2.msra.mxu0 %v1045_v16 }
 0x2e5   :  { %1739 = vmatprep.subr.mxu1 %v716_v17  ;;  %1810 = vmatprep.subr.mxu0 %v1036_v21 }
 0x2e6   :  { %1740 = vmatpush2.msra.mxu1 %v715_v24  ;;  %1811 = vmatpush2.msra.mxu0 %v1035_v25 }
 0x2e7   :  { %1741 = vmatprep.subr.mxu1 %v706_v26  ;;  %1812 = vmatprep.subr.mxu0 %v1026_v27 }
 0x2e8   :  { %1742 = vmatpush2.msra.mxu1 %v705_v28  ;;  %1813 = vmatpush2.msra.mxu0 %v1025_v29 }
 0x2e9   :  { %1743 = vmatprep.subr.mxu1 %v696_v30  ;;  %1814 = vmatprep.subr.mxu0 %v1016_v31 }
 0x2ea   :  { %1744 = vmatpush2.msra.mxu1 %v695_v32  ;;  %1815 = vmatpush2.msra.mxu0 %v1015_v33  ;;  %v1099_v32 = vsub.s32 4, %v2273_v18 }
 0x2eb   :  { %1745 = vmatprep.subr.mxu1 %v686_v34  ;;  %1816 = vmatprep.subr.mxu0 %v1006_v35 }
 0x2ec   :  { %1746 = vmatpush2.msra.mxu1 %v685_v40  ;;  %1817 = vmatpush2.msra.mxu0 %v1005_v41 }
 0x2ed   :  { %1747 = vmatprep.subr.mxu1 %v676_v42  ;;  %1818 = vmatprep.subr.mxu0 %v996_v43 }
 0x2ee   :  { %1748 = vmatpush2.msra.mxu1 %v675_v44  ;;  %1819 = vmatpush2.msra.mxu0 %v995_v45 }
 0x2ef   :  { %1749 = vmatprep.subr.mxu1 %v666_v46  ;;  %1820 = vmatprep.subr.mxu0 %v986_v47 }
 0x2f0   :  { %1750 = vmatpush2.msra.mxu1 %v665_v48  ;;  %1821 = vmatpush2.msra.mxu0 %v985_v49 }
 0x2f1   :  { %1751 = vmatprep.subr.mxu1 %v656_v50  ;;  %1822 = vmatprep.subr.mxu0 %v976_v51 }
 0x2f2   :  { %1752 = vmatpush2.msra.mxu1 %v655_v52  ;;  %1823 = vmatpush2.msra.mxu0 %v975_v53 }
 0x2f3   :  { %1753 = vmatprep.subr.mxu1 %v646_v54  ;;  %1824 = vmatprep.subr.mxu0 %v966_v55 }
 0x2f4   :  { %1754 = vmatpush2.msra.mxu1 %v645_v56  ;;  %1825 = vmatpush2.msra.mxu0 %v965_v57  ;;  %v1107_v56 = vsub.s32 6, %v2273_v18  ;;  %v1111_v57 = vsub.s32 7, %v2273_v18 }
 0x2f5   :  { %1755 = vmatprep.subr.mxu1 %v636_v58  ;;  %1826 = vmatprep.subr.mxu0 %v956_v59 }
 0x2f6   :  { %1756 = vmatpush2.msra.mxu1 %v635_v60  ;;  %1827 = vmatpush2.msra.mxu0 %v955_v61  ;;  %v1108_v58 = vrot.slane %v2311_v14, %v1107_v56  ;;  %v1112_v59 = vrot.slane %v2311_v14, %v1111_v57 }
 0x2f7   :  { %1757 = vmatprep.subr.mxu1 %v626_v62  ;;  %1828 = vmatprep.subr.mxu0 %v946_v63  ;;  %v1339_v6 = vpop.f32.mrf.mxu1  ;;  %v1410_v7 = vpop.f32.mrf.mxu0 }
 0x2f8   :  { %1758 = vmatpush2.msra.mxu1 %v625_v2  ;;  %1829 = vmatpush2.msra.mxu0 %v945_v36  ;;  %v1340_v9 = vadd.f32 %v1339_v6, %v1092_v1 }
 0x2f9   :  { %1759 = vmatprep.subr.mxu1 %v616_v0  ;;  %1830 = vmatprep.subr.mxu0 %v936_v37  ;;  %v1341_v12 = vpop.f32.mrf.mxu1  ;;  %v1412_v15 = vpop.f32.mrf.mxu0 }
 0x2fa   :  { %1760 = vmatpush2.msra.mxu1 %v615_v4  ;;  %1831 = vmatpush2.msra.mxu0 %v935_v5  ;;  %v1411_v13 = vadd.f32 %v1410_v7, %v1340_v9  ;;  %v1342_v23 = vadd.f32 %v1341_v12, %v1096_v3  ;;  %v1078_v9 = vld [vmem:[#allocation13 + $0x8] sm:$0x3] }
 0x2fb   :  { %1761 = vmatprep.subr.mxu1 %v606_v20  ;;  %1832 = vmatprep.subr.mxu0 %v926_v8 }
 0x2fc   :  { %1762 = vmatpush2.msra.mxu1 %v605_v10  ;;  %1833 = vmatpush2.msra.mxu0 %v925_v11  ;;  %v1843_v16 = vsub.f32 0.0, %v1411_v13  ;;  %v1413_v17 = vadd.f32 %v1412_v15, %v1342_v23  ;;  %v1116_v10 = vrot.slane %v1078_v9, %v2276_v19  ;;  %v1120_v11 = vrot.slane %v1078_v9, %v2280_v22 }
 0x2fd   :  { %1764 = vmatmul.mubr.f32.vlgmr.msra.gmra.mxu1 %v2293_v38  ;;  %1835 = vmatmul.mubr.f32.vlgmr.msra.gmra.mxu0 %v2295_v39  ;;  %v1103_v38 = vsub.s32 5, %v2273_v18  ;;  %v1100_v39 = vrot.slane %v2311_v14, %v1099_v32 }
 0x2fe   :  { %v1855_v21 = vmul.f32 1.442695, %v1843_v16  ;;  %v1844_v24 = vsub.f32 0.0, %v1413_v17 }
 0x2ff   :  { %v1104_v33 = vrot.slane %v2311_v14, %v1103_v38 }
 0x300   :  { %1983 = vpow2.f32 %v1855_v21  ;;  %v1857_v25 = vmul.f32 1.442695, %v1844_v24 }
 0x302   :  { %1985 = vpow2.f32 %v1857_v25 }
 0x30d   :  { %v1984_v26 = vpop.eup %1983 }
 0x30e   :  { %v1873_v27 = vadd.f32 1.0, %v1984_v26 }
 0x30f   :  { %v1986_v28 = vpop.eup %1985 }
 0x310   :  { %1987 = vrcp.f32 %v1873_v27  ;;  %v1874_v29 = vadd.f32 1.0, %v1986_v28 }
 0x312   :  { %1989 = vrcp.f32 %v1874_v29 }
 0x31d   :  { %v1988_v30 = vpop.eup %1987 }
 0x31e   :  { %1903 = vst [vmem:[#allocation14 + $0x10] sm:$0xff] %v1988_v30 }
 0x31f   :  { %v1990_v31 = vpop.eup %1989 }
 0x320   :  { %1904 = vst [vmem:[#allocation14 + $0x18] sm:$0xff] %v1990_v31 }
 0x339   :  { %v1481_v34 = vpop.f32.mrf.mxu1  ;;  %v1552_v35 = vpop.f32.mrf.mxu0 }
 0x33a   :  { %v1482_v40 = vadd.f32 %v1481_v34, %v1100_v39 }
 0x33b   :  { %v1483_v41 = vpop.f32.mrf.mxu1  ;;  %v1554_v44 = vpop.f32.mrf.mxu0 }
 0x33c   :  { %v1553_v42 = vadd.f32 %v1552_v35, %v1482_v40  ;;  %v1484_v43 = vadd.f32 %v1483_v41, %v1104_v33 }
 0x33e   :  { %v1845_v45 = vsub.f32 0.0, %v1553_v42  ;;  %v1555_v46 = vadd.f32 %v1554_v44, %v1484_v43 }
 0x340   :  { %v1859_v47 = vmul.f32 1.442695, %v1845_v45  ;;  %v1846_v48 = vsub.f32 0.0, %v1555_v46 }
 0x342   :  { %1991 = vpow2.f32 %v1859_v47  ;;  %v1861_v49 = vmul.f32 1.442695, %v1846_v48 }
 0x344   :  { %1993 = vpow2.f32 %v1861_v49 }
 0x34f   :  { %v1992_v50 = vpop.eup %1991 }
 0x350   :  { %v1875_v51 = vadd.f32 1.0, %v1992_v50 }
 0x351   :  { %v1994_v52 = vpop.eup %1993 }
 0x352   :  { %1995 = vrcp.f32 %v1875_v51  ;;  %v1876_v53 = vadd.f32 1.0, %v1994_v52 }
 0x354   :  { %1997 = vrcp.f32 %v1876_v53 }
 0x35f   :  { %v1996_v54 = vpop.eup %1995 }
 0x360   :  { %1905 = vst [vmem:[#allocation14 + $0x20] sm:$0xff] %v1996_v54 }
 0x361   :  { %v1998_v55 = vpop.eup %1997 }
 0x362   :  { %1906 = vst [vmem:[#allocation14 + $0x28] sm:$0xff] %v1998_v55 }
 0x37b   :  { %v1623_v60 = vpop.f32.mrf.mxu1  ;;  %v1694_v61 = vpop.f32.mrf.mxu0 }
 0x37c   :  { %v1624_v62 = vadd.f32 %v1623_v60, %v1108_v58 }
 0x37d   :  { %v1625_v63 = vpop.f32.mrf.mxu1  ;;  %v1696_v36 = vpop.f32.mrf.mxu0 }
 0x37e   :  { %v1695_v1 = vadd.f32 %v1694_v61, %v1624_v62  ;;  %v1626_v2 = vadd.f32 %v1625_v63, %v1112_v59 }
 0x380   :  { %v1847_v0 = vsub.f32 0.0, %v1695_v1  ;;  %v1697_v37 = vadd.f32 %v1696_v36, %v1626_v2 }
 0x382   :  { %v1863_v3 = vmul.f32 1.442695, %v1847_v0  ;;  %v1848_v4 = vsub.f32 0.0, %v1697_v37 }
 0x384   :  { %1999 = vpow2.f32 %v1863_v3  ;;  %v1865_v5 = vmul.f32 1.442695, %v1848_v4 }
 0x386   :  { %2001 = vpow2.f32 %v1865_v5 }
 0x391   :  { %v2000_v6 = vpop.eup %1999 }
 0x392   :  { %v1877_v18 = vadd.f32 1.0, %v2000_v6 }
 0x393   :  { %v2002_v7 = vpop.eup %2001 }
 0x394   :  { %2003 = vrcp.f32 %v1877_v18  ;;  %v1878_v20 = vadd.f32 1.0, %v2002_v7 }
 0x396   :  { %2005 = vrcp.f32 %v1878_v20 }
 0x3a1   :  { %v2004_v14 = vpop.eup %2003 }
 0x3a2   :  { %1907 = vst [vmem:[#allocation14 + $0x30] sm:$0xff] %v2004_v14 }
 0x3a3   :  { %v2006_v8 = vpop.eup %2005 }
 0x3a4   :  { %1908 = vst [vmem:[#allocation14 + $0x38] sm:$0xff] %v2006_v8 }
 0x3bd   :  { %v1765_v12 = vpop.f32.mrf.mxu1  ;;  %v1836_v13 = vpop.f32.mrf.mxu0 }
 0x3be   :  { %v1766_v23 = vadd.f32 %v1765_v12, %v1116_v10 }
 0x3bf   :  { %v1767_v15 = vpop.f32.mrf.mxu1  ;;  %v1838_v21 = vpop.f32.mrf.mxu0 }
 0x3c0   :  { %v1837_v16 = vadd.f32 %v1836_v13, %v1766_v23  ;;  %v1768_v17 = vadd.f32 %v1767_v15, %v1120_v11 }
 0x3c2   :  { %v1849_v24 = vsub.f32 0.0, %v1837_v16  ;;  %v1839_v25 = vadd.f32 %v1838_v21, %v1768_v17 }
 0x3c4   :  { %v1867_v26 = vmul.f32 1.442695, %v1849_v24  ;;  %v1850_v27 = vsub.f32 0.0, %v1839_v25 }
 0x3c6   :  { %2007 = vpow2.f32 %v1867_v26  ;;  %v1869_v28 = vmul.f32 1.442695, %v1850_v27 }
 0x3c8   :  { %2009 = vpow2.f32 %v1869_v28 }
 0x3d3   :  { %v2008_v29 = vpop.eup %2007 }
 0x3d4   :  { %v1879_v30 = vadd.f32 1.0, %v2008_v29 }
 0x3d5   :  { %v2010_v31 = vpop.eup %2009 }
 0x3d6   :  { %2011 = vrcp.f32 %v1879_v30  ;;  %v1880_v19 = vadd.f32 1.0, %v2010_v31 }
 0x3d8   :  { %2013 = vrcp.f32 %v1880_v19 }
 0x3e3   :  { %v2012_v22 = vpop.eup %2011 }
 0x3e4   :  { %1909 = vst [vmem:[#allocation14 + $0x40] sm:$0xff] %v2012_v22 }
 0x3e5   :  { %v2014_v32 = vpop.eup %2013 }
 0x3e6   :  { %1910 = vst [vmem:[#allocation14 + $0x48] sm:$0xff] %v2014_v32 }
 0x3e7   :  { %2166 = shalt.err (!%p2163_p11)
}
 0x3e8   :  { %1920 = dma.vmem_to_hbm [thread:$0]  %s1918_s6, 1280, %s2349_s7, [#allocation4]  }
 0x3e9   :  { %2183 = dma.done.wait [#allocation4], 1280  }
 0x3ea   :  { %2184 = vsyncadd [#allocation4], 4294966016 }
 0x3eb   :  { %1924 = vsyncpa [#allocation3], 1 }
 0x3ec   :  { %1925 = vsyncpa [#allocation6], 1 }
 0x3ed   :  { %1926 = vsyncpa [#allocation9], 1 }
 0x3ee   :  { %1927 = vsyncpa [#allocation12], 1 }
 0x3ef   :  { %1928 = vsyncpa [#allocation4], 1 }

</bundles_post_ra>
